<compile_context>
chip_gen: v5e
topology: v5e:2x2
jax: 0.10.0
libtpu: 0.0.40
codegen_flags: <defaults>
</compile_context>

<pallas_src>
import numpy as np

import jax
import jax.numpy as jnp
from jax.experimental import pallas as pl
from jax.experimental.pallas import tpu as pltpu

CONV3_OUT = 256          # resnet18 backbone output channels (conv3_out['resnet18'])
REDUCED_CHANNELS = 128   # reduced_channels in net.py
NUM_CLASSES = 10
NC_PAD = 128             # class dim padded to a full lane group (lane-dense stores)
LEAKY_SLOPE = 0.01       # nn.LeakyReLU() default negative_slope

TARGET_ROWS = 256        # ~rows per grid step (fills the MXU, amortizes step overhead)
MIN_ROWS = 128           # don't shrink steps below this just to get more grid steps
MAX_ROWS = 1024          # hard cap on rows per step
MAX_BLOCK_BYTES = 4 << 20  # cap on the bf16 x-block (double-buffered -> 8 MiB max)


def _choose_block(n, s8):
    """Pick batch elements per grid step (nb) and the grid size.

    Rows per step = nb * s8 (s8 = folded rows per image, multiple of 8).
    Targets ~TARGET_ROWS rows, keeps >=2 grid steps when possible (v7x has two
    TensorCores and the batch axis is marked 'parallel'), floors at ~MIN_ROWS,
    and caps block size so double-buffering fits every generation's default
    scoped VMEM.  No rounding of nb to 8/16 is needed anywhere.
    """
    nb = max(1, -(-TARGET_ROWS // s8))
    if n >= 2:
        nb = min(nb, -(-n // 2))                 # >= 2 steps for v7x's 2 TCs
    nb = max(nb, min(n, -(-MIN_ROWS // s8)))     # ...but keep >= ~MIN_ROWS rows/step
    row_cap = max(1, MAX_ROWS // s8)
    byte_cap = max(1, MAX_BLOCK_BYTES // (s8 * 4 * CONV3_OUT * 2))
    nb = max(1, min(nb, n, row_cap, byte_cap))
    return nb, -(-n // nb)


def _fold_input(x, n_pad, ho, wo):
    """(N, C, H, W) f32 -> (n_pad * S8, 4*C) bf16 parity-folded layout.

    Single XLA pad/transpose/cast pass: reads x once (f32), writes bf16 once.
    Row (n*S8 + hh*Wh + wh), lane ((hp*2+wp)*C + c) holds x[n, 2hh+hp, 2wh+wp, c].
    """
    n, c, h, w = x.shape
    hh, wh = ho + 1, wo + 1
    s = hh * wh
    s8 = -(-s // 8) * 8
    xb = x.astype(jnp.bfloat16)
    xb = jnp.pad(xb, ((0, n_pad - n), (0, 0), (0, 2 * hh - h), (0, 2 * wh - w)))
    xb = xb.reshape(n_pad, c, hh, 2, wh, 2)
    xb = xb.transpose(0, 2, 4, 3, 5, 1)                 # (n, hh, wh, hp, wp, c)
    xb = xb.reshape(n_pad, s, 4 * c)
    if s8 != s:
        xb = jnp.pad(xb, ((0, 0), (0, s8 - s), (0, 0)))
    return xb.reshape(n_pad * s8, 4 * c)


def _pool_matrix(nb, s8, ho, wo, wh, r_acc):
    """Block-diagonal one-hot pooling matrix (nb, r_acc), bf16 (0/1 exact).

    Selects exactly the Ho*Wo valid conv-output rows of each batch element in
    the step; halo / pad / garbage accumulator rows get weight 0.
    Built with numpy at trace time -> constant-folded by XLA.
    """
    r = np.arange(r_acc)
    n_of_r, rem = r // s8, r % s8
    hh_i, ww_i = rem // wh, rem % wh
    valid = (hh_i < ho) & (ww_i < wo)
    m = np.zeros((nb, r_acc), np.float32)
    m[n_of_r[valid], r[valid]] = 1.0
    return jnp.asarray(m, dtype=jnp.bfloat16)


def _make_head_kernel(wh, r_acc, c, inv_p):
    """Kernel closure over static geometry (all Python ints / floats)."""

    def kernel(x_ref, wc_ref, bc_ref, wf_ref, bf_ref, pool_ref, out_ref):
        # x_ref:    (nb*S8, 4*C) bf16 parity-folded feature rows for nb images
        # wc_ref:   (9*C, 128)   bf16 conv weight, tap-major
        # bc_ref:   (1, 128)     f32  conv bias
        # wf_ref:   (128, 128)   bf16 fc weight, class dim zero-padded
        # bf_ref:   (1, 128)     f32  fc bias, zero-padded
        # pool_ref: (nb, r_acc)  bf16 block-diagonal pooling one-hots
        # out_ref:  (nb, 128)    f32  padded logits (leading grid dim squeezed)
        acc = jnp.zeros((r_acc, REDUCED_CHANNELS), jnp.float32)
        for ki in range(3):
            for kj in range(3):
                dh, hp = divmod(ki, 2)
                dw, wp = divmod(kj, 2)
                pc = 2 * hp + wp                 # parity lane group of this tap
                r0 = dh * wh + dw                # row shift of this tap
                t = ki * 3 + kj
                lhs = x_ref[pl.ds(r0, r_acc), pl.ds(pc * c, c)]      # (r_acc, C)
                w_t = wc_ref[pl.ds(t * c, c), :]                     # (C, 128)
                acc = acc + jnp.dot(lhs, w_t,
                                    preferred_element_type=jnp.float32)
        conv = acc + bc_ref[...]                                     # (r_acc, 128)
        act = jnp.where(conv > 0, conv, LEAKY_SLOPE * conv)          # LeakyReLU
        # AdaptiveAvgPool2d((1,1)) as a one-hot matmul: masks halo/pad rows and
        # avoids any reshape/sum relayout across (8,128) tile boundaries.
        pooled = jnp.dot(pool_ref[...], act.astype(jnp.bfloat16),
                         preferred_element_type=jnp.float32) * inv_p  # (nb, 128)
        out_ref[...] = jnp.dot(pooled.astype(jnp.bfloat16), wf_ref[...],
                               preferred_element_type=jnp.float32) + bf_ref[...]

    return kernel


def fashionet_head(x, conv_w, conv_b, fc_w, fc_b):
    """x: (N, CONV3_OUT, H, W) backbone feature map (float32).
       conv_w: (128, CONV3_OUT, 3, 3), conv_b: (128,)
       fc_w:   (num_classes, 128),     fc_b:  (num_classes,)  (torch layout)
       returns logits (N, num_classes)."""
    N, C, H, W = x.shape
    Ho = (H - 3) // 2 + 1
    Wo = (W - 3) // 2 + 1
    Hh, Wh = Ho + 1, Wo + 1
    S = Hh * Wh
    S8 = -(-S // 8) * 8
    nc = fc_w.shape[0]

    nb, gsteps = _choose_block(N, S8)
    n_pad = nb * gsteps
    # Accumulator rows per step: all base rows whose 9 shifted tap reads stay
    # inside the block (max shift = Wh+1); covers every valid output row.
    r_acc = nb * S8 - (Wh + 1)

    xf = _fold_input(x, n_pad, Ho, Wo)                            # (n_pad*S8, 4C) bf16

    # Conv weight, tap-major rows: row (t*C + c) = conv_w[:, c, ki, kj].
    wc = conv_w.transpose(2, 3, 1, 0).reshape(9 * C, REDUCED_CHANNELS)
    wc = wc.astype(jnp.bfloat16)
    bc = conv_b.reshape(1, REDUCED_CHANNELS).astype(jnp.float32)
    wf = (jnp.zeros((REDUCED_CHANNELS, NC_PAD), jnp.float32)
          .at[:, :nc].set(fc_w.T).astype(jnp.bfloat16))
    bf = jnp.zeros((1, NC_PAD), jnp.float32).at[:, :nc].set(fc_b)
    pool = _pool_matrix(nb, S8, Ho, Wo, Wh, r_acc)                # (nb, r_acc) bf16

    # Explicit VMEM budget: 2x-buffered x block + resident constants + values.
    xblk_bytes = nb * S8 * 4 * C * 2
    const_bytes = (wc.size * 2 + bc.size * 4 + wf.size * 2 + bf.size * 4
                   + pool.size * 2)
    est = (2 * xblk_bytes + 2 * const_bytes + 2 * nb * NC_PAD * 4
           + 4 * r_acc * REDUCED_CHANNELS * 4 + (1 << 20))
    vmem_limit = int(min(64 << 20, max(32 << 20, 2 * est)))

    flops = gsteps * (2 * 9 * r_acc * C * REDUCED_CHANNELS
                      + 2 * nb * r_acc * REDUCED_CHANNELS
                      + 2 * nb * REDUCED_CHANNELS * NC_PAD)
    bytes_accessed = (xf.size * 2 + gsteps * const_bytes
                      + gsteps * nb * NC_PAD * 4)

    out = pl.pallas_call(
        _make_head_kernel(Wh, r_acc, C, 1.0 / float(Ho * Wo)),
        out_shape=jax.ShapeDtypeStruct((gsteps, nb, NC_PAD), jnp.float32),
        grid_spec=pltpu.PrefetchScalarGridSpec(
            num_scalar_prefetch=0,
            grid=(gsteps,),
            in_specs=[
                pl.BlockSpec((nb * S8, 4 * C), lambda g: (g, 0)),
                pl.BlockSpec((9 * C, REDUCED_CHANNELS), lambda g: (0, 0)),
                pl.BlockSpec((1, REDUCED_CHANNELS), lambda g: (0, 0)),
                pl.BlockSpec((REDUCED_CHANNELS, NC_PAD), lambda g: (0, 0)),
                pl.BlockSpec((1, NC_PAD), lambda g: (0, 0)),
                pl.BlockSpec((nb, r_acc), lambda g: (0, 0)),
            ],
            out_specs=pl.BlockSpec((None, nb, NC_PAD), lambda g: (g, 0, 0)),
        ),
        compiler_params=pltpu.CompilerParams(
            dimension_semantics=("parallel",),
            vmem_limit_bytes=vmem_limit),
        cost_estimate=pl.CostEstimate(
            flops=int(flops), transcendentals=0,
            bytes_accessed=int(bytes_accessed)),
    )(xf, wc, bc, wf, bf, pool)

    return out.reshape(n_pad, NC_PAD)[:N, :nc]


def _reference(x, conv_w, conv_b, fc_w, fc_b, compute_dtype=jnp.float32):
    """Plain-JAX reference of the same head.  compute_dtype=bfloat16 mirrors the
    kernel's bf16 multiplicands (f32 accumulation) for a tight comparison."""
    xc = x.astype(compute_dtype)
    wcc = conv_w.astype(compute_dtype)
    y = jax.lax.conv_general_dilated(
        xc, wcc, window_strides=(2, 2), padding="VALID",
        dimension_numbers=("NCHW", "OIHW", "NCHW"),
        preferred_element_type=jnp.float32)
    y = y + conv_b[None, :, None, None]
    y = jnp.where(y > 0, y, LEAKY_SLOPE * y)
    y = jnp.mean(y, axis=(2, 3))                # (N, 128)
    return y @ fc_w.T + fc_b


def _check(x, conv_w, conv_b, fc_w, fc_b):
    head = jax.jit(fashionet_head)
    out = jax.block_until_ready(head(x, conv_w, conv_b, fc_w, fc_b))
    assert out.shape == (x.shape[0], fc_w.shape[0])
    ref_bf16 = jax.block_until_ready(
        _reference(x, conv_w, conv_b, fc_w, fc_b, compute_dtype=jnp.bfloat16))
    assert jnp.allclose(out, ref_bf16, rtol=1e-2, atol=1e-2), "mismatch vs bf16 reference"
    ref_f32 = jax.block_until_ready(
        _reference(x, conv_w, conv_b, fc_w, fc_b, compute_dtype=jnp.float32))
    assert jnp.allclose(out, ref_f32, rtol=5e-2, atol=2e-2), "mismatch vs f32 reference"
    return out


if __name__ == "__main__":
    key = jax.random.PRNGKey(0)
    k1, k2, k3, k4, k5, k6 = jax.random.split(key, 6)

    # Deterministic parameter init (shapes from nn.Conv2d / nn.Linear in __init__).
    conv_w = 0.02 * jax.random.normal(k2, (REDUCED_CHANNELS, CONV3_OUT, 3, 3), jnp.float32)
    conv_b = 0.01 * jax.random.normal(k3, (REDUCED_CHANNELS,), jnp.float32)
    fc_w = 0.05 * jax.random.normal(k4, (NUM_CLASSES, REDUCED_CHANNELS), jnp.float32)
    fc_b = 0.01 * jax.random.normal(k5, (NUM_CLASSES,), jnp.float32)

    # Case 1: tiny backbone feature map, single grid step (9x9 -> 4x4 conv out).
    x1 = jax.random.normal(k1, (2, CONV3_OUT, 9, 9), dtype=jnp.float32)
    _check(x1, conv_w, conv_b, fc_w, fc_b)

    # Case 2: asymmetric spatial dims, batch not divisible by nb -> multi-step
    # grid with batch padding (exercises the 'parallel' grid / squeezed out dim).
    x2 = jax.random.normal(k6, (5, CONV3_OUT, 11, 9), dtype=jnp.float32)
    _check(x2, conv_w, conv_b, fc_w, fc_b)

    print("KERNEL_OK")
</pallas_src>

<mosaic_0001>
module attributes {stable_mosaic.version = 11 : i64} {
  func.func @kernel(%arg0: i32, %arg1: memref<64x1024xbf16, #tpu.memory_space<vmem>>, %arg2: memref<2304x128xbf16, #tpu.memory_space<vmem>>, %arg3: memref<1x128xf32, #tpu.memory_space<vmem>>, %arg4: memref<128x128xbf16, #tpu.memory_space<vmem>>, %arg5: memref<1x128xf32, #tpu.memory_space<vmem>>, %arg6: memref<2x58xbf16, #tpu.memory_space<vmem>>, %arg7: memref<1x2x128xf32, #tpu.memory_space<vmem>>) attributes {dimension_semantics = [#tpu.dimension_semantics<parallel>], iteration_bounds = array<i64: 1>, scalar_prefetch = 0 : i64, scratch_operands = 0 : i64, tpu.core_type = #tpu.core_type<tc>, window_params = [{transform_indices = @transform_0, window_bounds = array<i64: 64, 1024>}, {pipeline_mode = #tpu.pipeline_mode<synchronous>, transform_indices = @transform_1, window_bounds = array<i64: 2304, 128>}, {pipeline_mode = #tpu.pipeline_mode<synchronous>, transform_indices = @transform_2, window_bounds = array<i64: 1, 128>}, {pipeline_mode = #tpu.pipeline_mode<synchronous>, transform_indices = @transform_3, window_bounds = array<i64: 128, 128>}, {pipeline_mode = #tpu.pipeline_mode<synchronous>, transform_indices = @transform_4, window_bounds = array<i64: 1, 128>}, {pipeline_mode = #tpu.pipeline_mode<synchronous>, transform_indices = @transform_5, window_bounds = array<i64: 2, 58>}, {transform_indices = @transform_6, window_bounds = array<i64: 1, 2, 128>}]} {
    %cst = arith.constant 0.000000e+00 : f32
    %0 = vector.broadcast %cst : f32 to vector<58x128xf32>
    %c0 = arith.constant 0 : index
    %c0_0 = arith.constant 0 : index
    %1 = vector.load %arg1[%c0, %c0_0] : memref<64x1024xbf16, #tpu.memory_space<vmem>>, vector<58x256xbf16>
    %c0_1 = arith.constant 0 : index
    %c0_2 = arith.constant 0 : index
    %2 = vector.load %arg2[%c0_1, %c0_2] : memref<2304x128xbf16, #tpu.memory_space<vmem>>, vector<256x128xbf16>
    %cst_3 = arith.constant dense<0.000000e+00> : vector<58x128xf32>
    %3 = tpu.matmul %1, %2, %cst_3 {dimension_numbers = #tpu.dot_dimension_numbers<[1], [0], [0], [1], [0, 0, 1, 1], [], []>} : vector<58x256xbf16>, vector<256x128xbf16>, vector<58x128xf32> -> vector<58x128xf32>
    %4 = arith.addf %0, %3 : vector<58x128xf32>
    %c0_4 = arith.constant 0 : index
    %c256 = arith.constant 256 : index
    %5 = vector.load %arg1[%c0_4, %c256] : memref<64x1024xbf16, #tpu.memory_space<vmem>>, vector<58x256xbf16>
    %c256_5 = arith.constant 256 : index
    %c0_6 = arith.constant 0 : index
    %6 = vector.load %arg2[%c256_5, %c0_6] : memref<2304x128xbf16, #tpu.memory_space<vmem>>, vector<256x128xbf16>
    %cst_7 = arith.constant dense<0.000000e+00> : vector<58x128xf32>
    %7 = tpu.matmul %5, %6, %cst_7 {dimension_numbers = #tpu.dot_dimension_numbers<[1], [0], [0], [1], [0, 0, 1, 1], [], []>} : vector<58x256xbf16>, vector<256x128xbf16>, vector<58x128xf32> -> vector<58x128xf32>
    %8 = arith.addf %4, %7 : vector<58x128xf32>
    %c1 = arith.constant 1 : index
    %c0_8 = arith.constant 0 : index
    %9 = vector.load %arg1[%c1, %c0_8] : memref<64x1024xbf16, #tpu.memory_space<vmem>>, vector<58x256xbf16>
    %c512 = arith.constant 512 : index
    %c0_9 = arith.constant 0 : index
    %10 = vector.load %arg2[%c512, %c0_9] : memref<2304x128xbf16, #tpu.memory_space<vmem>>, vector<256x128xbf16>
    %cst_10 = arith.constant dense<0.000000e+00> : vector<58x128xf32>
    %11 = tpu.matmul %9, %10, %cst_10 {dimension_numbers = #tpu.dot_dimension_numbers<[1], [0], [0], [1], [0, 0, 1, 1], [], []>} : vector<58x256xbf16>, vector<256x128xbf16>, vector<58x128xf32> -> vector<58x128xf32>
    %12 = arith.addf %8, %11 : vector<58x128xf32>
    %c0_11 = arith.constant 0 : index
    %c512_12 = arith.constant 512 : index
    %13 = vector.load %arg1[%c0_11, %c512_12] : memref<64x1024xbf16, #tpu.memory_space<vmem>>, vector<58x256xbf16>
    %c768 = arith.constant 768 : index
    %c0_13 = arith.constant 0 : index
    %14 = vector.load %arg2[%c768, %c0_13] : memref<2304x128xbf16, #tpu.memory_space<vmem>>, vector<256x128xbf16>
    %cst_14 = arith.constant dense<0.000000e+00> : vector<58x128xf32>
    %15 = tpu.matmul %13, %14, %cst_14 {dimension_numbers = #tpu.dot_dimension_numbers<[1], [0], [0], [1], [0, 0, 1, 1], [], []>} : vector<58x256xbf16>, vector<256x128xbf16>, vector<58x128xf32> -> vector<58x128xf32>
    %16 = arith.addf %12, %15 : vector<58x128xf32>
    %c0_15 = arith.constant 0 : index
    %c768_16 = arith.constant 768 : index
    %17 = vector.load %arg1[%c0_15, %c768_16] : memref<64x1024xbf16, #tpu.memory_space<vmem>>, vector<58x256xbf16>
    %c1024 = arith.constant 1024 : index
    %c0_17 = arith.constant 0 : index
    %18 = vector.load %arg2[%c1024, %c0_17] : memref<2304x128xbf16, #tpu.memory_space<vmem>>, vector<256x128xbf16>
    %cst_18 = arith.constant dense<0.000000e+00> : vector<58x128xf32>
    %19 = tpu.matmul %17, %18, %cst_18 {dimension_numbers = #tpu.dot_dimension_numbers<[1], [0], [0], [1], [0, 0, 1, 1], [], []>} : vector<58x256xbf16>, vector<256x128xbf16>, vector<58x128xf32> -> vector<58x128xf32>
    %20 = arith.addf %16, %19 : vector<58x128xf32>
    %c1_19 = arith.constant 1 : index
    %c512_20 = arith.constant 512 : index
    %21 = vector.load %arg1[%c1_19, %c512_20] : memref<64x1024xbf16, #tpu.memory_space<vmem>>, vector<58x256xbf16>
    %c1280 = arith.constant 1280 : index
    %c0_21 = arith.constant 0 : index
    %22 = vector.load %arg2[%c1280, %c0_21] : memref<2304x128xbf16, #tpu.memory_space<vmem>>, vector<256x128xbf16>
    %cst_22 = arith.constant dense<0.000000e+00> : vector<58x128xf32>
    %23 = tpu.matmul %21, %22, %cst_22 {dimension_numbers = #tpu.dot_dimension_numbers<[1], [0], [0], [1], [0, 0, 1, 1], [], []>} : vector<58x256xbf16>, vector<256x128xbf16>, vector<58x128xf32> -> vector<58x128xf32>
    %24 = arith.addf %20, %23 : vector<58x128xf32>
    %c5 = arith.constant 5 : index
    %c0_23 = arith.constant 0 : index
    %25 = vector.load %arg1[%c5, %c0_23] : memref<64x1024xbf16, #tpu.memory_space<vmem>>, vector<58x256xbf16>
    %c1536 = arith.constant 1536 : index
    %c0_24 = arith.constant 0 : index
    %26 = vector.load %arg2[%c1536, %c0_24] : memref<2304x128xbf16, #tpu.memory_space<vmem>>, vector<256x128xbf16>
    %cst_25 = arith.constant dense<0.000000e+00> : vector<58x128xf32>
    %27 = tpu.matmul %25, %26, %cst_25 {dimension_numbers = #tpu.dot_dimension_numbers<[1], [0], [0], [1], [0, 0, 1, 1], [], []>} : vector<58x256xbf16>, vector<256x128xbf16>, vector<58x128xf32> -> vector<58x128xf32>
    %28 = arith.addf %24, %27 : vector<58x128xf32>
    %c5_26 = arith.constant 5 : index
    %c256_27 = arith.constant 256 : index
    %29 = vector.load %arg1[%c5_26, %c256_27] : memref<64x1024xbf16, #tpu.memory_space<vmem>>, vector<58x256xbf16>
    %c1792 = arith.constant 1792 : index
    %c0_28 = arith.constant 0 : index
    %30 = vector.load %arg2[%c1792, %c0_28] : memref<2304x128xbf16, #tpu.memory_space<vmem>>, vector<256x128xbf16>
    %cst_29 = arith.constant dense<0.000000e+00> : vector<58x128xf32>
    %31 = tpu.matmul %29, %30, %cst_29 {dimension_numbers = #tpu.dot_dimension_numbers<[1], [0], [0], [1], [0, 0, 1, 1], [], []>} : vector<58x256xbf16>, vector<256x128xbf16>, vector<58x128xf32> -> vector<58x128xf32>
    %32 = arith.addf %28, %31 : vector<58x128xf32>
    %c6 = arith.constant 6 : index
    %c0_30 = arith.constant 0 : index
    %33 = vector.load %arg1[%c6, %c0_30] : memref<64x1024xbf16, #tpu.memory_space<vmem>>, vector<58x256xbf16>
    %c2048 = arith.constant 2048 : index
    %c0_31 = arith.constant 0 : index
    %34 = vector.load %arg2[%c2048, %c0_31] : memref<2304x128xbf16, #tpu.memory_space<vmem>>, vector<256x128xbf16>
    %cst_32 = arith.constant dense<0.000000e+00> : vector<58x128xf32>
    %35 = tpu.matmul %33, %34, %cst_32 {dimension_numbers = #tpu.dot_dimension_numbers<[1], [0], [0], [1], [0, 0, 1, 1], [], []>} : vector<58x256xbf16>, vector<256x128xbf16>, vector<58x128xf32> -> vector<58x128xf32>
    %36 = arith.addf %32, %35 : vector<58x128xf32>
    %c0_33 = arith.constant 0 : index
    %c0_34 = arith.constant 0 : index
    %37 = vector.load %arg3[%c0_33, %c0_34] : memref<1x128xf32, #tpu.memory_space<vmem>>, vector<1x128xf32>
    %38 = vector.broadcast %37 : vector<1x128xf32> to vector<58x128xf32>
    %39 = arith.addf %36, %38 : vector<58x128xf32>
    %cst_35 = arith.constant 0.000000e+00 : f32
    %40 = vector.broadcast %cst_35 : f32 to vector<58x128xf32>
    %41 = arith.cmpf ogt, %39, %40 : vector<58x128xf32>
    %cst_36 = arith.constant 0.00999999977 : f32
    %42 = vector.broadcast %cst_36 : f32 to vector<58x128xf32>
    %43 = arith.mulf %42, %39 : vector<58x128xf32>
    %44 = arith.select %41, %39, %43 : vector<58x128xi1>, vector<58x128xf32>
    %c0_37 = arith.constant 0 : index
    %c0_38 = arith.constant 0 : index
    %45 = vector.load %arg6[%c0_37, %c0_38] : memref<2x58xbf16, #tpu.memory_space<vmem>>, vector<2x58xbf16>
    %46 = arith.truncf %44 : vector<58x128xf32> to vector<58x128xbf16>
    %cst_39 = arith.constant dense<0.000000e+00> : vector<2x128xf32>
    %47 = tpu.matmul %45, %46, %cst_39 {dimension_numbers = #tpu.dot_dimension_numbers<[1], [0], [0], [1], [0, 0, 1, 1], [], []>} : vector<2x58xbf16>, vector<58x128xbf16>, vector<2x128xf32> -> vector<2x128xf32>
    %cst_40 = arith.constant 6.250000e-02 : f32
    %48 = vector.broadcast %cst_40 : f32 to vector<2x128xf32>
    %49 = arith.mulf %47, %48 : vector<2x128xf32>
    %50 = arith.truncf %49 : vector<2x128xf32> to vector<2x128xbf16>
    %c0_41 = arith.constant 0 : index
    %c0_42 = arith.constant 0 : index
    %51 = vector.load %arg4[%c0_41, %c0_42] : memref<128x128xbf16, #tpu.memory_space<vmem>>, vector<128x128xbf16>
    %cst_43 = arith.constant dense<0.000000e+00> : vector<2x128xf32>
    %52 = tpu.matmul %50, %51, %cst_43 {dimension_numbers = #tpu.dot_dimension_numbers<[1], [0], [0], [1], [0, 0, 1, 1], [], []>} : vector<2x128xbf16>, vector<128x128xbf16>, vector<2x128xf32> -> vector<2x128xf32>
    %c0_44 = arith.constant 0 : index
    %c0_45 = arith.constant 0 : index
    %53 = vector.load %arg5[%c0_44, %c0_45] : memref<1x128xf32, #tpu.memory_space<vmem>>, vector<1x128xf32>
    %54 = vector.broadcast %53 : vector<1x128xf32> to vector<2x128xf32>
    %55 = arith.addf %52, %54 : vector<2x128xf32>
    %c0_46 = arith.constant 0 : index
    %c0_47 = arith.constant 0 : index
    %c0_48 = arith.constant 0 : index
    %56 = vector.load %arg7[%c0_46, %c0_47, %c0_48] : memref<1x2x128xf32, #tpu.memory_space<vmem>>, vector<1x2x128xf32>
    %57 = vector.shape_cast %56 : vector<1x2x128xf32> to vector<2x128xf32>
    %58 = vector.shape_cast %55 : vector<2x128xf32> to vector<1x2x128xf32>
    tpu.vector_store %arg7[%c0_46, %c0_47, %c0_48], %58 {strides = array<i32>} : memref<1x2x128xf32, #tpu.memory_space<vmem>>, vector<1x2x128xf32>,
    return
  }
  func.func @transform_0(%arg0: i32) -> (i32, i32) {
    %c0_i32 = arith.constant 0 : i32
    %c0_i32_0 = arith.constant 0 : i32
    return %arg0, %c0_i32 : i32, i32
  }
  func.func @transform_1(%arg0: i32) -> (i32, i32) {
    %c0_i32 = arith.constant 0 : i32
    %c0_i32_0 = arith.constant 0 : i32
    %c0_i32_1 = arith.constant 0 : i32
    return %c0_i32, %c0_i32_0 : i32, i32
  }
  func.func @transform_2(%arg0: i32) -> (i32, i32) {
    %c0_i32 = arith.constant 0 : i32
    %c0_i32_0 = arith.constant 0 : i32
    %c0_i32_1 = arith.constant 0 : i32
    return %c0_i32, %c0_i32_0 : i32, i32
  }
  func.func @transform_3(%arg0: i32) -> (i32, i32) {
    %c0_i32 = arith.constant 0 : i32
    %c0_i32_0 = arith.constant 0 : i32
    %c0_i32_1 = arith.constant 0 : i32
    return %c0_i32, %c0_i32_0 : i32, i32
  }
  func.func @transform_4(%arg0: i32) -> (i32, i32) {
    %c0_i32 = arith.constant 0 : i32
    %c0_i32_0 = arith.constant 0 : i32
    %c0_i32_1 = arith.constant 0 : i32
    return %c0_i32, %c0_i32_0 : i32, i32
  }
  func.func @transform_5(%arg0: i32) -> (i32, i32) {
    %c0_i32 = arith.constant 0 : i32
    %c0_i32_0 = arith.constant 0 : i32
    %c0_i32_1 = arith.constant 0 : i32
    return %c0_i32, %c0_i32_0 : i32, i32
  }
  func.func @transform_6(%arg0: i32) -> (i32, i32, i32) {
    %c0_i32 = arith.constant 0 : i32
    %c0_i32_0 = arith.constant 0 : i32
    %c0_i32_1 = arith.constant 0 : i32
    return %arg0, %c0_i32, %c0_i32_0 : i32, i32, i32
  }
}

</mosaic_0001>

<bundles_post_ra>
// kernel: fashionet_head.1
= control target key start
LH: loop header
LB: loop body
LE: loop exit
PB: predicated region body
PF: predicated region fallthrough
CT: control target
= control target key end

     0   :  { %s4448_s0 = inlined_call_operand.vmem [shape: bf16[64,1024], index: 0, kind: input, shape index: {}]   ;;  %s4449_s1 = inlined_call_operand.vmem [shape: bf16[2304,128], index: 1, kind: input, shape index: {}]   ;;  %s4450_s2 = inlined_call_operand.vmem [shape: f32[1,128], index: 2, kind: input, shape index: {}]   ;;  %s4451_s3 = inlined_call_operand.vmem [shape: bf16[128,128], index: 3, kind: input, shape index: {}]   ;;  %s4452_s4 = inlined_call_operand.vmem [shape: f32[1,128], index: 4, kind: input, shape index: {}]   ;;  %s4453_s5 = inlined_call_operand.vmem [shape: bf16[2,58], index: 5, kind: input, shape index: {}]   ;;  %s4454_s6 = inlined_call_operand.hbm [shape: f32[1,2,128], index: 6, kind: output, shape index: {}]  }
   0x1   :  { %v3180_v0 = vld [vmem:[%s4449_s1 + $0xb8] sm:$0xff]  ;;  %v3179_v2 = vld [vmem:[%s4449_s1 + $0xb0] sm:$0xff]  ;;  %v3178_v4 = vld [vmem:[%s4449_s1 + $0xa8] sm:$0xff] }
   0x2   :  { %v3188_v1 = vld [vmem:[%s4449_s1 + $0xf8] sm:$0xff]  ;;  %241 = vmatpush.bf16.msra.mxu0 %v3180_v0  ;;  %3323 = vmatpush.bf16.msra.mxu2 %v3180_v0  ;;  %v3187_v3 = vld [vmem:[%s4449_s1 + $0xf0] sm:$0xff]  ;;  %v3186_v5 = vld [vmem:[%s4449_s1 + $0xe8] sm:$0xff] }
   0x3   :  { %270 = vmatpush.bf16.msra.mxu1 %v3188_v1  ;;  %3331 = vmatpush.bf16.msra.mxu3 %v3188_v1  ;;  %v3177_v6 = vld [vmem:[%s4449_s1 + $0xa0] sm:$0xff]  ;;  %v3176_v8 = vld [vmem:[%s4449_s1 + $0x98] sm:$0xff] }
   0x4   :  { %v3185_v7 = vld [vmem:[%s4449_s1 + $0xe0] sm:$0xff]  ;;  %v3184_v9 = vld [vmem:[%s4449_s1 + $0xd8] sm:$0xff] }
   0x6   :  { %242 = vmatpush.bf16.msra.mxu0 %v3179_v2  ;;  %3324 = vmatpush.bf16.msra.mxu2 %v3179_v2 }
   0x7   :  { %271 = vmatpush.bf16.msra.mxu1 %v3187_v3  ;;  %3332 = vmatpush.bf16.msra.mxu3 %v3187_v3 }
   0xa   :  { %243 = vmatpush.bf16.msra.mxu0 %v3178_v4  ;;  %3325 = vmatpush.bf16.msra.mxu2 %v3178_v4 }
   0xb   :  { %272 = vmatpush.bf16.msra.mxu1 %v3186_v5  ;;  %3333 = vmatpush.bf16.msra.mxu3 %v3186_v5 }
   0xe   :  { %244 = vmatpush.bf16.msra.mxu0 %v3177_v6  ;;  %3326 = vmatpush.bf16.msra.mxu2 %v3177_v6 }
   0xf   :  { %273 = vmatpush.bf16.msra.mxu1 %v3185_v7  ;;  %3334 = vmatpush.bf16.msra.mxu3 %v3185_v7 }
  0x10   :  { %11 = vsyncpa [#allocation3], 0  ;;  %v3175_v10 = vld [vmem:[%s4449_s1 + $0x90] sm:$0xff]  ;;  %v3174_v12 = vld [vmem:[%s4449_s1 + $0x88] sm:$0xff]  ;;  %vm531_vm0 = vsmask.f32 7424 }
  0x11   :  { %v3183_v11 = vld [vmem:[%s4449_s1 + $0xd0] sm:$0xff]  ;;  %v65_v13 = vld [vmem:[%s4448_s0 + $0x8] sm:$0xff]  ;;  %v3173_v18 = vld [vmem:[%s4449_s1 + $0x80] sm:$0xff]  ;;  %vm1562_vm1 = vsmask.f32 5376  ;;  %vm2105_vm2 = vcmask 1044480  }
  0x12   :  { %245 = vmatpush.bf16.msra.mxu0 %v3176_v8  ;;  %3327 = vmatpush.bf16.msra.mxu2 %v3176_v8  ;;  %v3449_v14 = vld [vmem:[%s4448_s0 + $0x28] sm:$0xff]  ;;  %v113_v16 = vunpack.c.l.b16 %v65_v13  ;;  %v114_v21 = vunpack.c.h.b16 %v65_v13  ;;  %v3181_v23 = vld [vmem:[%s4449_s1 + $0xc0] sm:$0xff]  ;;  %v3160_v26 = vld [vmem:[%s4449_s1 + $0x38] sm:$0xff]  ;;  %vm2331_vm11 = vcmask 474112   ;;  %s3368_s18 = smov [#allocation2]   ;;  %s2443_s20 = sshll.u32 %s4454_s6, 4  ;;  %s2444_s20 = int_to_ptr.hbm [resolvable:$true] %s2443_s20 }
  0x13   :  { %274 = vmatpush.bf16.msra.mxu1 %v3184_v9  ;;  %3335 = vmatpush.bf16.msra.mxu3 %v3184_v9  ;;  %v3182_v15 = vld [vmem:[%s4449_s1 + $0xc8] sm:$0xff]  ;;  %v115_v17 = vunpack.c.l.b16 %v3449_v14  ;;  %v116_v22 = vunpack.c.h.b16 %v3449_v14  ;;  %v3168_v27 = vld [vmem:[%s4449_s1 + $0x78] sm:$0xff]  ;;  %v3159_v34 = vld [vmem:[%s4449_s1 + $0x30] sm:$0xff] }
  0x14   :  { %v2462_v19 = vld [vmem:[%s4448_s0 + $0x88] sm:$0xf]  ;;  %v3171_v24 = vld [vmem:[%s4448_s0 + $0x8c] sm:$0xf]  ;;  %v3196_v32 = vld [vmem:[%s4449_s1 + $0x138] sm:$0xff] }
  0x15   :  { %v3172_v20 = vld [vmem:[%s4448_s0 + $0xa4] sm:$0xf0]  ;;  %v2464_v25 = vld [vmem:[%s4448_s0 + $0xa8] sm:$0xf0]  ;;  %v129_v28 = vpack.c.b16 %v115_v17, %v113_v16  ;;  %v130_v30 = vpack.c.b16 %v116_v22, %v114_v21  ;;  %v3204_v33 = vld [vmem:[%s4449_s1 + $0x178] sm:$0xff] }
  0x16   :  { %246 = vmatpush.bf16.msra.mxu0 %v3175_v10  ;;  %3328 = vmatpush.bf16.msra.mxu2 %v3175_v10  ;;  %v3482_v29 = vor.u32 %v3172_v20, %v2462_v19  ;;  %v3486_v31 = vor.u32 %v3171_v24, %v2464_v25  ;;  %v3167_v35 = vld [vmem:[%s4449_s1 + $0x70] sm:$0xff]  ;;  %v3158_v38 = vld [vmem:[%s4449_s1 + $0x28] sm:$0xff]  ;;  %v3157_v44 = vld [vmem:[%s4449_s1 + $0x20] sm:$0xff] }
  0x17   :  { %275 = vmatpush.bf16.msra.mxu1 %v3183_v11  ;;  %3336 = vmatpush.bf16.msra.mxu3 %v3183_v11  ;;  %v3195_v36 = vld [vmem:[%s4449_s1 + $0x130] sm:$0xff]  ;;  %v3166_v39 = vld [vmem:[%s4449_s1 + $0x68] sm:$0xff]  ;;  %v3165_v45 = vld [vmem:[%s4449_s1 + $0x60] sm:$0xff] }
  0x18   :  { %v3203_v37 = vld [vmem:[%s4449_s1 + $0x170] sm:$0xff]  ;;  %v3517_v40 = vld [vmem:[%s4448_s0 + $0xc8] sm:$0xff]  ;;  %v25_v46 = vld [vmem:[%s4448_s0] sm:$0xff] }
  0x19   :  { %v72_v41 = vld [vmem:[%s4448_s0 + $0xe8] sm:$0x11]  ;;  %v26_v47 = vld [vmem:[%s4448_s0 + $0x20] sm:$0xff]  ;;  %v125_v48 = vunpack.c.l.b16 %v3517_v40  ;;  %v4455_v53 = vunpack.c.h.b16 %v3517_v40  ;;  %v307_v58 = vunpack.c.l.b16 %v25_v46  ;;  %v3156_v60 = vld [vmem:[%s4449_s1 + $0x18] sm:$0xff]  ;;  %v308_v62 = vunpack.c.h.b16 %v25_v46 }
  0x1a   :  { %247 = vmatpush.bf16.msra.mxu0 %v3174_v12  ;;  %3329 = vmatpush.bf16.msra.mxu2 %v3174_v12  ;;  %v3194_v42 = vld [vmem:[%s4449_s1 + $0x128] sm:$0xff]  ;;  %v127_v49 = vunpack.c.l.b16 %v72_v41  ;;  %v3193_v50 = vld [vmem:[%s4449_s1 + $0x120] sm:$0xff]  ;;  %v128_v54 = vunpack.c.h.b16 %v72_v41  ;;  %v3560_v59 = vunpack.c.l.b16 %v26_v47  ;;  %v3164_v61 = vld [vmem:[%s4449_s1 + $0x58] sm:$0xff]  ;;  %v3568_v63 = vunpack.c.h.b16 %v26_v47 }
  0x1b   :  { %276 = vmatpush.bf16.msra.mxu1 %v3182_v15  ;;  %3337 = vmatpush.bf16.msra.mxu3 %v3182_v15  ;;  %v3202_v43 = vld [vmem:[%s4449_s1 + $0x168] sm:$0xff]  ;;  %v3201_v55 = vld [vmem:[%s4449_s1 + $0x160] sm:$0xff]  ;;  %v3192_v4 = vld [vmem:[%s4449_s1 + $0x118] sm:$0xff] }
  0x1c   :  { %v2454_v51 = vld [vmem:[%s4448_s0 + $0x48] sm:$0xf]  ;;  %v3169_v56 = vld [vmem:[%s4448_s0 + $0x4c] sm:$0xf]  ;;  %v135_v1 = vpack.c.b16 %v127_v49, %v125_v48  ;;  %v136_v3 = vpack.c.b16 %v128_v54, %v4455_v53  ;;  %v3200_v5 = vld [vmem:[%s4449_s1 + $0x158] sm:$0xff]  ;;  %v323_v7 = vpack.c.b16 %v3560_v59, %v307_v58  ;;  %v324_v9 = vpack.c.b16 %v3568_v63, %v308_v62 }
  0x1d   :  { %v3170_v52 = vld [vmem:[%s4448_s0 + $0x64] sm:$0xf0]  ;;  %v2456_v57 = vld [vmem:[%s4448_s0 + $0x68] sm:$0xf0]  ;;  %v3155_v6 = vld [vmem:[%s4449_s1 + $0x10] sm:$0xff] }
  0x1e   :  { %248 = vmatpush.bf16.msra.mxu0 %v3173_v18  ;;  %3330 = vmatpush.bf16.msra.mxu2 %v3173_v18  ;;  %v3570_v0 = vor.u32 %v3170_v52, %v2454_v51  ;;  %v3574_v2 = vor.u32 %v3169_v56, %v2456_v57  ;;  %v3163_v8 = vld [vmem:[%s4449_s1 + $0x50] sm:$0xff]  ;;  %v2534_v10 = vld [vmem:[%s4448_s0 + $0x40] sm:$0xf]  ;;  %v3149_v12 = vld [vmem:[%s4448_s0 + $0x44] sm:$0xf]  ;;  %v535_v18 = vshll.u32 %v323_v7, 16 }
  0x1f   :  { %277 = vmatpush.bf16.msra.mxu1 %v3181_v23  ;;  %3338 = vmatpush.bf16.msra.mxu3 %v3181_v23  ;;  %v3150_v11 = vld [vmem:[%s4448_s0 + $0x5c] sm:$0xf0]  ;;  %v2536_v13 = vld [vmem:[%s4448_s0 + $0x60] sm:$0xf0]  ;;  %v3191_v15 = vld [vmem:[%s4449_s1 + $0x110] sm:$0xff]  ;;  %v547_v23 = vshll.u32 %v324_v9, 16 }
  0x20   :  { %v3199_v16 = vld [vmem:[%s4449_s1 + $0x150] sm:$0xff]  ;;  %v3612_v19 = vor.u32 %v3150_v11, %v2534_v10  ;;  %v3154_v20 = vld [vmem:[%s4449_s1 + $0x8] sm:$0xff]  ;;  %v3620_v24 = vor.u32 %v3149_v12, %v2536_v13  ;;  %v2542_v46 = vld [vmem:[%s4448_s0 + $0x80] sm:$0xf] }
  0x21   :  { %249 = vmatmul.bf16.vlgmr.msra.gmra.mxu0 %v129_v28  ;;  %259 = vmatmul.bf16.vlgmr.msra.gmra.mxu2 %v3482_v29  ;;  %v3162_v21 = vld [vmem:[%s4449_s1 + $0x48] sm:$0xff]  ;;  %v537_v28 = vrot.slane %v535_v18, 1  ;;  %v3152_v47 = vld [vmem:[%s4448_s0 + $0x9c] sm:$0xf0]  ;;  %v3151_v49 = vld [vmem:[%s4448_s0 + $0x84] sm:$0xf] }
  0x22   :  { %435 = vmatpush.bf16.msrb.mxu2 %v3160_v26  ;;  %278 = vmatmul.bf16.vlgmr.msra.gmra.mxu1 %v130_v30  ;;  %v3190_v25 = vld [vmem:[%s4449_s1 + $0x108] sm:$0xff]  ;;  %v540_v30 = vshll.u32 %v3612_v19, 16  ;;  %v3218_v51 = vld [vmem:[%s4449_s1 + $0x1b8] sm:$0xff]  ;;  %v3217_v58 = vld [vmem:[%s4449_s1 + $0x1b0] sm:$0xff] }
  0x23   :  { %464 = vmatpush.bf16.msrb.mxu3 %v3168_v27  ;;  %698 = vmatpush.bf16.msrb.mxu0 %v3196_v32  ;;  %v3198_v26 = vld [vmem:[%s4449_s1 + $0x148] sm:$0xff]  ;;  %v533_v27 = vshrl.u32 %v323_v7, 16  ;;  %v3153_v32 = vld [vmem:[%s4449_s1] sm:$0xff]  ;;  %v3226_v52 = vld [vmem:[%s4449_s1 + $0x1f8] sm:$0xff] }
  0x24   :  { %288 = vmatmul.bf16.vlgmr.msra.gmra.mxu3 %v3486_v31  ;;  %727 = vmatpush.bf16.msrb.mxu1 %v3204_v33  ;;  %v3161_v33 = vld [vmem:[%s4449_s1 + $0x40] sm:$0xff]  ;;  %v542_v41 = vrot.slane %v540_v30, 1  ;;  %v3242_v54 = vld [vmem:[%s4449_s1 + $0x238] sm:$0xff]  ;;  %v3249_v62 = vld [vmem:[%s4449_s1 + $0x270] sm:$0xff] }
  0x25   :  { %v3250_v56 = vld [vmem:[%s4449_s1 + $0x278] sm:$0xff]  ;;  %v31_v12 = vld [vmem:[%s4448_s0 + $0xc0] sm:$0xff] }
  0x26   :  { %436 = vmatpush.bf16.msrb.mxu2 %v3159_v34  ;;  %v545_v34 = vshrl.u32 %v324_v9, 16  ;;  %v3215_v18 = vld [vmem:[%s4449_s1 + $0x1a0] sm:$0xff] }
  0x27   :  { %465 = vmatpush.bf16.msrb.mxu3 %v3167_v35  ;;  %699 = vmatpush.bf16.msrb.mxu0 %v3195_v36  ;;  %v549_v35 = vrot.slane %v547_v23, 1  ;;  %v552_v36 = vshll.u32 %v3620_v24, 16 }
  0x28   :  { %728 = vmatpush.bf16.msrb.mxu1 %v3203_v37  ;;  %v3189_v37 = vld [vmem:[%s4449_s1 + $0x100] sm:$0xff] }
  0x2a   :  { %437 = vmatpush.bf16.msrb.mxu2 %v3158_v38  ;;  %v3197_v38 = vld [vmem:[%s4449_s1 + $0x140] sm:$0xff] }
  0x2b   :  { %466 = vmatpush.bf16.msrb.mxu3 %v3166_v39  ;;  %700 = vmatpush.bf16.msrb.mxu0 %v3194_v42  ;;  %v538_v39 = vor.u32 %v537_v28, %v533_v27  ;;  %v550_v42 = vor.u32 %v549_v35, %v545_v34  ;;  %v3731_v28 = vunpack.c.h.b16 %v31_v12  ;;  %v3214_v34 = vld [vmem:[%s4449_s1 + $0x198] sm:$0xff] }
  0x2c   :  { %729 = vmatpush.bf16.msrb.mxu1 %v3202_v43  ;;  %v554_v43 = vrot.slane %v552_v36, 1  ;;  %v3222_v35 = vld [vmem:[%s4449_s1 + $0x1d8] sm:$0xff] }
  0x2e   :  { %438 = vmatpush.bf16.msrb.mxu2 %v3157_v44  ;;  %v543_v44 = vsel %vm531_vm0, %v538_v39, %v542_v41 }
  0x2f   :  { %467 = vmatpush.bf16.msrb.mxu3 %v3165_v45  ;;  %701 = vmatpush.bf16.msrb.mxu0 %v3193_v50  ;;  %v555_v45 = vsel %vm531_vm0, %v550_v42, %v554_v43  ;;  %v2544_v50 = vld [vmem:[%s4448_s0 + $0xa0] sm:$0xf0]  ;;  %v3213_v42 = vld [vmem:[%s4449_s1 + $0x190] sm:$0xff] }
  0x30   :  { %730 = vmatpush.bf16.msrb.mxu1 %v3201_v55  ;;  %v3669_v55 = vor.u32 %v3152_v47, %v2542_v46  ;;  %v3674_v57 = vor.u32 %v3151_v49, %v2544_v50  ;;  %v3245_v50 = vld [vmem:[%s4449_s1 + $0x250] sm:$0xff] }
  0x31   :  { %254 = vmatmul.bf16.gmra.mxu0 %v3570_v0  ;;  %264 = vmatmul.bf16.gmra.mxu2 %v135_v1  ;;  %v556_v1 = vshrl.u32 %v3612_v19, 16 }
  0x32   :  { %439 = vmatpush.bf16.msrb.mxu2 %v3156_v60  ;;  %283 = vmatmul.bf16.gmra.mxu1 %v3574_v2  ;;  %v3225_v60 = vld [vmem:[%s4449_s1 + $0x1f0] sm:$0xff]  ;;  %v580_v47 = vshrl.u32 %v3674_v57, 16 }
  0x33   :  { %468 = vmatpush.bf16.msrb.mxu3 %v3164_v61  ;;  %702 = vmatpush.bf16.msrb.mxu0 %v3192_v4  ;;  %v3241_v61 = vld [vmem:[%s4449_s1 + $0x230] sm:$0xff]  ;;  %v564_v4 = vshrl.u32 %v3620_v24, 16  ;;  %v558_v10 = vor.u32 %v556_v1, %v542_v41  ;;  %v3246_v41 = vld [vmem:[%s4449_s1 + $0x258] sm:$0xff] }
  0x34   :  { %293 = vmatmul.bf16.gmra.mxu3 %v136_v3  ;;  %731 = vmatpush.bf16.msrb.mxu1 %v3200_v5  ;;  %v560_v3 = vshll.u32 %v3669_v55, 16  ;;  %v568_v5 = vshll.u32 %v3674_v57, 16 }
  0x35   :  { %v566_v13 = vor.u32 %v564_v4, %v554_v43  ;;  %v3221_v43 = vld [vmem:[%s4449_s1 + $0x1d0] sm:$0xff] }
  0x36   :  { %440 = vmatpush.bf16.msrb.mxu2 %v3155_v6  ;;  %v3216_v6 = vld [vmem:[%s4449_s1 + $0x1a8] sm:$0xff]  ;;  %v562_v11 = vrot.slane %v560_v3, 1 }
  0x37   :  { %469 = vmatpush.bf16.msrb.mxu3 %v3163_v8  ;;  %703 = vmatpush.bf16.msrb.mxu0 %v3191_v15  ;;  %v3240_v8 = vld [vmem:[%s4449_s1 + $0x228] sm:$0xff]  ;;  %v570_v15 = vrot.slane %v568_v5, 1 }
  0x38   :  { %732 = vmatpush.bf16.msrb.mxu1 %v3199_v16  ;;  %v493_v16 = vld [vmem:[%s4448_s0 + $0xe0] sm:$0x33]  ;;  %v563_v23 = vsel %vm531_vm0, %v558_v10, %v562_v11 }
  0x39   :  { %v571_v27 = vsel %vm531_vm0, %v566_v13, %v570_v15 }
  0x3a   :  { %441 = vmatpush.bf16.msrb.mxu2 %v3154_v20  ;;  %v3223_v20 = vld [vmem:[%s4449_s1 + $0x1e0] sm:$0xff] }
  0x3b   :  { %470 = vmatpush.bf16.msrb.mxu3 %v3162_v21  ;;  %704 = vmatpush.bf16.msrb.mxu0 %v3190_v25  ;;  %v3239_v21 = vld [vmem:[%s4449_s1 + $0x220] sm:$0xff]  ;;  %v3728_v25 = vunpack.c.l.b16 %v31_v12 }
  0x3c   :  { %733 = vmatpush.bf16.msrb.mxu1 %v3198_v26  ;;  %v527_v26 = vunpack.c.l.b16 %v493_v16  ;;  %v32_v12 = vld [vmem:[%s4448_s0 + $0xe0] sm:$0x11] }
  0x3d   :  { %v321_v13 = vunpack.c.l.b16 %v32_v12 }
  0x3e   :  { %442 = vmatpush.bf16.msrb.mxu2 %v3153_v32  ;;  %v528_v32 = vunpack.c.h.b16 %v493_v16 }
  0x3f   :  { %471 = vmatpush.bf16.msrb.mxu3 %v3161_v33  ;;  %705 = vmatpush.bf16.msrb.mxu0 %v3189_v37  ;;  %v3247_v33 = vld [vmem:[%s4449_s1 + $0x260] sm:$0xff]  ;;  %v3238_v37 = vld [vmem:[%s4449_s1 + $0x218] sm:$0xff] }
  0x40   :  { %734 = vmatpush.bf16.msrb.mxu1 %v3197_v38  ;;  %v529_v38 = vpack.c.b16 %v527_v26, %v3728_v25  ;;  %v530_v39 = vpack.c.b16 %v528_v32, %v3731_v28  ;;  %v3206_v32 = vld [vmem:[%s4448_s0 + $0x2c] sm:$0xf0] }
  0x41   :  { %443 = vmatmul.bf16.vlgmr.msrb.gmra.mxu2 %v323_v7  ;;  %v3224_v7 = vld [vmem:[%s4449_s1 + $0x1e8] sm:$0xff] }
  0x42   :  { %706 = vmatmul.bf16.vlgmr.msrb.gmra.mxu0 %v543_v44  ;;  %940 = vmatpush.bf16.msra.mxu2 %v3218_v51  ;;  %v3237_v44 = vld [vmem:[%s4449_s1 + $0x210] sm:$0xff]  ;;  %v576_v46 = vshll.u32 %v529_v38, 16  ;;  %v584_v49 = vshll.u32 %v530_v39, 16  ;;  %v3212_v51 = vld [vmem:[%s4449_s1 + $0x188] sm:$0xff]  ;;  %v588_v16 = vshrl.u32 %v529_v38, 16 }
  0x43   :  { %735 = vmatmul.bf16.vlgmr.msrb.gmra.mxu1 %v555_v45  ;;  %969 = vmatpush.bf16.msra.mxu3 %v3226_v52  ;;  %v572_v45 = vshrl.u32 %v3669_v55, 16  ;;  %v3220_v52 = vld [vmem:[%s4449_s1 + $0x1c8] sm:$0xff]  ;;  %v3227_v38 = vld [vmem:[%s4448_s0 + $0x1c] sm:$0xf] }
  0x44   :  { %472 = vmatmul.bf16.vlgmr.msrb.gmra.mxu3 %v324_v9  ;;  %1182 = vmatpush.bf16.msra.mxu0 %v3242_v54  ;;  %v3248_v9 = vld [vmem:[%s4449_s1 + $0x268] sm:$0xff] }
  0x45   :  { %1211 = vmatpush.bf16.msra.mxu1 %v3250_v56  ;;  %v3236_v54 = vld [vmem:[%s4449_s1 + $0x208] sm:$0xff]  ;;  %v574_v56 = vor.u32 %v572_v45, %v562_v11  ;;  %v3243_v11 = vld [vmem:[%s4449_s1 + $0x240] sm:$0xff] }
  0x46   :  { %941 = vmatpush.bf16.msra.mxu2 %v3217_v58  ;;  %v578_v58 = vrot.slane %v576_v46, 1  ;;  %v3258_v46 = vld [vmem:[%s4449_s1 + $0x2b8] sm:$0xff] }
  0x47   :  { %970 = vmatpush.bf16.msra.mxu3 %v3225_v60  ;;  %v582_v60 = vor.u32 %v580_v47, %v570_v15  ;;  %v322_v15 = vunpack.c.h.b16 %v32_v12  ;;  %v3230_v12 = vld [vmem:[%s4448_s0 + $0x74] sm:$0xf0] }
  0x48   :  { %1183 = vmatpush.bf16.msra.mxu0 %v3241_v61  ;;  %v586_v61 = vrot.slane %v584_v49, 1  ;;  %v3266_v49 = vld [vmem:[%s4449_s1 + $0x2f8] sm:$0xff] }
  0x49   :  { %1212 = vmatpush.bf16.msra.mxu1 %v3249_v62  ;;  %v3244_v62 = vld [vmem:[%s4449_s1 + $0x248] sm:$0xff] }
  0x4a   :  { %942 = vmatpush.bf16.msra.mxu2 %v3216_v6  ;;  %v3211_v6 = vld [vmem:[%s4449_s1 + $0x180] sm:$0xff]  ;;  %v587_v10 = vsel %vm531_vm0, %v582_v60, %v586_v61  ;;  %v3256_v60 = vld [vmem:[%s4449_s1 + $0x2a8] sm:$0xff] }
  0x4b   :  { %971 = vmatpush.bf16.msra.mxu3 %v3224_v7  ;;  %v3219_v7 = vld [vmem:[%s4449_s1 + $0x1c0] sm:$0xff] }
  0x4c   :  { %1184 = vmatpush.bf16.msra.mxu0 %v3240_v8  ;;  %v579_v8 = vsel %vm531_vm0, %v574_v56, %v578_v58  ;;  %v3273_v56 = vld [vmem:[%s4449_s1 + $0x330] sm:$0xff] }
  0x4d   :  { %1213 = vmatpush.bf16.msra.mxu1 %v3248_v9  ;;  %v3235_v9 = vld [vmem:[%s4449_s1 + $0x200] sm:$0xff] }
  0x4e   :  { %943 = vmatpush.bf16.msra.mxu2 %v3215_v18  ;;  %v591_v18 = vshrl.u32 %v530_v39, 16  ;;  %v2768_v39 = vld [vmem:[%s4448_s0 + $0x38] sm:$0xf0] }
  0x4f   :  { %972 = vmatpush.bf16.msra.mxu3 %v3223_v20  ;;  %v329_v20 = vpack.c.b16 %v321_v13, %v3728_v25  ;;  %v3229_v13 = vld [vmem:[%s4448_s0 + $0x5c] sm:$0xf] }
  0x50   :  { %1185 = vmatpush.bf16.msra.mxu0 %v3239_v21  ;;  %v330_v21 = vpack.c.b16 %v322_v15, %v3731_v28  ;;  %v593_v26 = vor.u32 %v591_v18, %v586_v61  ;;  %v2686_v61 = vld [vmem:[%s4448_s0 + $0x50] sm:$0xf]  ;;  %v2776_v15 = vld [vmem:[%s4448_s0 + $0x78] sm:$0xf0] }
  0x51   :  { %448 = vmatmul.bf16.gmra.mxu2 %v3612_v19  ;;  %1214 = vmatpush.bf16.msra.mxu1 %v3247_v33  ;;  %v3205_v33 = vld [vmem:[%s4448_s0 + $0x14] sm:$0xf] }
  0x52   :  { %711 = vmatmul.bf16.gmra.mxu0 %v563_v23  ;;  %944 = vmatpush.bf16.msra.mxu2 %v3214_v34  ;;  %v590_v23 = vor.u32 %v588_v16, %v578_v58  ;;  %v2680_v34 = vld [vmem:[%s4448_s0 + $0x30] sm:$0xf0] }
  0x53   :  { %740 = vmatmul.bf16.gmra.mxu1 %v571_v27  ;;  %973 = vmatpush.bf16.msra.mxu3 %v3222_v35  ;;  %v2678_v27 = vld [vmem:[%s4448_s0 + $0x10] sm:$0xf]  ;;  %v2766_v35 = vld [vmem:[%s4448_s0 + $0x18] sm:$0xf] }
  0x54   :  { %477 = vmatmul.bf16.gmra.mxu3 %v3620_v24  ;;  %1186 = vmatpush.bf16.msra.mxu0 %v3238_v37  ;;  %v3228_v37 = vld [vmem:[%s4448_s0 + $0x34] sm:$0xf0]  ;;  %v3281_v58 = vld [vmem:[%s4449_s1 + $0x370] sm:$0xff] }
  0x55   :  { %1215 = vmatpush.bf16.msra.mxu1 %v3246_v41  ;;  %v3827_v41 = vor.u32 %v3206_v32, %v2678_v27  ;;  %v3271_v27 = vld [vmem:[%s4449_s1 + $0x320] sm:$0xff] }
  0x56   :  { %945 = vmatpush.bf16.msra.mxu2 %v3213_v42  ;;  %v3829_v42 = vor.u32 %v3205_v33, %v2680_v34  ;;  %v3279_v32 = vld [vmem:[%s4449_s1 + $0x360] sm:$0xff]  ;;  %v3254_v33 = vld [vmem:[%s4449_s1 + $0x298] sm:$0xff] }
  0x57   :  { %974 = vmatpush.bf16.msra.mxu3 %v3221_v43  ;;  %v2767_v43 = vor.u32 %v3228_v37, %v2766_v35  ;;  %v3262_v34 = vld [vmem:[%s4449_s1 + $0x2d8] sm:$0xff] }
  0x58   :  { %1187 = vmatpush.bf16.msra.mxu0 %v3237_v44  ;;  %v2771_v44 = vor.u32 %v3227_v38, %v2768_v39  ;;  %v3270_v35 = vld [vmem:[%s4449_s1 + $0x318] sm:$0xff]  ;;  %v3253_v38 = vld [vmem:[%s4449_s1 + $0x290] sm:$0xff] }
  0x59   :  { %1216 = vmatpush.bf16.msra.mxu1 %v3245_v50  ;;  %v3274_v50 = vld [vmem:[%s4449_s1 + $0x338] sm:$0xff]  ;;  %v3261_v39 = vld [vmem:[%s4449_s1 + $0x2d0] sm:$0xff] }
  0x5a   :  { %946 = vmatpush.bf16.msra.mxu2 %v3212_v51  ;;  %v3282_v51 = vld [vmem:[%s4449_s1 + $0x378] sm:$0xff] }
  0x5b   :  { %975 = vmatpush.bf16.msra.mxu3 %v3220_v52  ;;  %v3257_v52 = vld [vmem:[%s4449_s1 + $0x2b0] sm:$0xff]  ;;  %v3278_v37 = vld [vmem:[%s4449_s1 + $0x358] sm:$0xff] }
  0x5c   :  { %1188 = vmatpush.bf16.msra.mxu0 %v3236_v54  ;;  %v3265_v54 = vld [vmem:[%s4449_s1 + $0x2f0] sm:$0xff] }
  0x5d   :  { %1217 = vmatpush.bf16.msra.mxu1 %v3244_v62  ;;  %v3264_v62 = vld [vmem:[%s4449_s1 + $0x2e8] sm:$0xff] }
  0x5e   :  { %947 = vmatpush.bf16.msra.mxu2 %v3211_v6  ;;  %v3272_v6 = vld [vmem:[%s4449_s1 + $0x328] sm:$0xff] }
  0x5f   :  { %976 = vmatpush.bf16.msra.mxu3 %v3219_v7  ;;  %v3208_v7 = vld [vmem:[%s4448_s0 + $0x6c] sm:$0xf0] }
  0x60   :  { %1189 = vmatpush.bf16.msra.mxu0 %v3235_v9  ;;  %v3280_v9 = vld [vmem:[%s4449_s1 + $0x368] sm:$0xff]  ;;  %v3893_v16 = vor.u32 %v3208_v7, %v2686_v61  ;;  %v3231_v61 = vld [vmem:[%s4448_s0 + $0x9c] sm:$0xf] }
  0x61   :  { %453 = vmatmul.bf16.gmra.mxu2 %v3669_v55  ;;  %1218 = vmatpush.bf16.msra.mxu1 %v3243_v11  ;;  %v2774_v11 = vld [vmem:[%s4448_s0 + $0x58] sm:$0xf] }
  0x62   :  { %716 = vmatmul.bf16.gmra.mxu0 %v579_v8  ;;  %1452 = vmatpush.bf16.msrb.mxu2 %v3258_v46  ;;  %v3207_v8 = vld [vmem:[%s4448_s0 + $0x54] sm:$0xf]  ;;  %v3252_v46 = vld [vmem:[%s4449_s1 + $0x288] sm:$0xff] }
  0x63   :  { %745 = vmatmul.bf16.gmra.mxu1 %v587_v10  ;;  %1481 = vmatpush.bf16.msrb.mxu3 %v3266_v49  ;;  %v2688_v10 = vld [vmem:[%s4448_s0 + $0x70] sm:$0xf0]  ;;  %v2694_v49 = vld [vmem:[%s4448_s0 + $0x90] sm:$0xf] }
  0x64   :  { %482 = vmatmul.bf16.gmra.mxu3 %v3674_v57  ;;  %1717 = vmatpush.bf16.msrb.mxu0 %v3274_v50  ;;  %v3895_v18 = vor.u32 %v3207_v8, %v2688_v10  ;;  %v3260_v50 = vld [vmem:[%s4449_s1 + $0x2c8] sm:$0xff] }
  0x65   :  { %1746 = vmatpush.bf16.msrb.mxu1 %v3282_v51  ;;  %v3210_v51 = vld [vmem:[%s4448_s0 + $0xac] sm:$0xf0] }
  0x66   :  { %1453 = vmatpush.bf16.msrb.mxu2 %v3257_v52  ;;  %v3209_v52 = vld [vmem:[%s4448_s0 + $0x94] sm:$0xf]  ;;  %v3971_v7 = vor.u32 %v3210_v51, %v2694_v49  ;;  %v3234_v51 = vld [vmem:[%s4448_s0 + $0xf4] sm:$0x10] }
  0x67   :  { %1482 = vmatpush.bf16.msrb.mxu3 %v3265_v54  ;;  %v2696_v54 = vld [vmem:[%s4448_s0 + $0xb0] sm:$0xf0] }
  0x68   :  { %1718 = vmatpush.bf16.msrb.mxu0 %v3273_v56  ;;  %v2782_v56 = vld [vmem:[%s4448_s0 + $0x98] sm:$0xf] }
  0x69   :  { %1747 = vmatpush.bf16.msrb.mxu1 %v3281_v58  ;;  %v3232_v58 = vld [vmem:[%s4448_s0 + $0xb4] sm:$0xf0] }
  0x6a   :  { %1454 = vmatpush.bf16.msrb.mxu2 %v3256_v60  ;;  %v3268_v60 = vld [vmem:[%s4449_s1 + $0x308] sm:$0xff]  ;;  %v2783_v10 = vor.u32 %v3232_v58, %v2782_v56  ;;  %v3233_v56 = vld [vmem:[%s4448_s0 + $0xdc] sm:$0xf] }
  0x6b   :  { %1483 = vmatpush.bf16.msrb.mxu3 %v3264_v62  ;;  %v2784_v62 = vld [vmem:[%s4448_s0 + $0xb8] sm:$0xf0] }
  0x6c   :  { %1719 = vmatpush.bf16.msrb.mxu0 %v3272_v6  ;;  %v3276_v6 = vld [vmem:[%s4449_s1 + $0x348] sm:$0xff]  ;;  %v2792_v58 = vld [vmem:[%s4448_s0 + $0xf8] sm:$0x10] }
  0x6d   :  { %1748 = vmatpush.bf16.msrb.mxu1 %v3280_v9  ;;  %v3973_v9 = vor.u32 %v3209_v52, %v2696_v54 }
  0x70   :  { %1720 = vmatpush.bf16.msrb.mxu0 %v3271_v27 }
  0x71   :  { %458 = vmatmul.bf16.gmra.mxu2 %v329_v20  ;;  %v2775_v20 = vor.u32 %v3230_v12, %v2774_v11  ;;  %1749 = vmatpush.bf16.msrb.mxu1 %v3279_v32  ;;  %v3251_v11 = vld [vmem:[%s4449_s1 + $0x280] sm:$0xff] }
  0x72   :  { %721 = vmatmul.bf16.gmra.mxu0 %v590_v23  ;;  %v3263_v23 = vld [vmem:[%s4449_s1 + $0x2e0] sm:$0xff] }
  0x73   :  { %750 = vmatmul.bf16.gmra.mxu1 %v593_v26  ;;  %v2779_v26 = vor.u32 %v3229_v13, %v2776_v15  ;;  %1484 = vmatpush.bf16.msrb.mxu3 %v3263_v23  ;;  %v3259_v12 = vld [vmem:[%s4449_s1 + $0x2c0] sm:$0xff]  ;;  %v2787_v15 = vor.u32 %v3231_v61, %v2784_v62 }
  0x74   :  { %487 = vmatmul.bf16.gmra.mxu3 %v330_v21  ;;  %v3255_v21 = vld [vmem:[%s4449_s1 + $0x2a0] sm:$0xff]  ;;  %1721 = vmatpush.bf16.msrb.mxu0 %v3270_v35  ;;  %v771_v35 = vld [vmem:[%s4448_s0 + $0xf0] sm:$0x11] }
  0x75   :  { %1455 = vmatpush.bf16.msrb.mxu2 %v3255_v21  ;;  %1750 = vmatpush.bf16.msrb.mxu1 %v3278_v37  ;;  %v3275_v23 = vld [vmem:[%s4449_s1 + $0x340] sm:$0xff]  ;;  %v827_v49 = vunpack.c.h.b16 %v771_v35 }
  0x77   :  { %1485 = vmatpush.bf16.msrb.mxu3 %v3262_v34  ;;  %v3996_v34 = vld [vmem:[%s4448_s0 + $0xd0] sm:$0xff] }
  0x79   :  { %1456 = vmatpush.bf16.msrb.mxu2 %v3254_v33 }
  0x7b   :  { %1486 = vmatpush.bf16.msrb.mxu3 %v3261_v39  ;;  %v1518_v39 = vld [vmem:[%s4448_s0] sm:$0xcc] }
  0x7c   :  { %v1554_v52 = vunpack.c.l.b16 %v1518_v39 }
  0x7d   :  { %1457 = vmatpush.bf16.msrb.mxu2 %v3253_v38 }
  0x7f   :  { %1487 = vmatpush.bf16.msrb.mxu3 %v3260_v50  ;;  %v2790_v50 = vld [vmem:[%s4448_s0 + $0xd8] sm:$0xf] }
  0x81   :  { %948 = vmatmul.bf16.vlgmr.msra.gmra.mxu2 %v3827_v41 }
  0x82   :  { %1190 = vmatmul.bf16.vlgmr.msra.gmra.mxu0 %v2767_v43  ;;  %v3269_v43 = vld [vmem:[%s4449_s1 + $0x310] sm:$0xff]  ;;  %1458 = vmatpush.bf16.msrb.mxu2 %v3252_v46  ;;  %v825_v46 = vunpack.c.h.b16 %v3996_v34 }
  0x83   :  { %1219 = vmatmul.bf16.vlgmr.msra.gmra.mxu1 %v2771_v44  ;;  %v3277_v44 = vld [vmem:[%s4449_s1 + $0x350] sm:$0xff]  ;;  %1722 = vmatpush.bf16.msrb.mxu0 %v3269_v43  ;;  %v824_v43 = vunpack.c.l.b16 %v3996_v34  ;;  %v3310_v34 = vld [vmem:[%s4449_s1 + $0x458] sm:$0xff] }
  0x84   :  { %977 = vmatmul.bf16.vlgmr.msra.gmra.mxu3 %v3829_v42  ;;  %1751 = vmatpush.bf16.msrb.mxu1 %v3277_v44  ;;  %v826_v44 = vunpack.c.l.b16 %v771_v35 }
  0x85   :  { %1488 = vmatpush.bf16.msrb.mxu3 %v3259_v12 }
  0x86   :  { %1459 = vmatpush.bf16.msrb.mxu2 %v3251_v11  ;;  %v834_v62 = vpack.c.b16 %v826_v44, %v824_v43  ;;  %v2791_v11 = vor.u32 %v3234_v51, %v2790_v50  ;;  %v1583_v50 = vrot.slane %v564_v4, 2  ;;  %v1572_v4 = vrot.slane %v540_v30, 3 }
  0x87   :  { %1723 = vmatpush.bf16.msrb.mxu0 %v3268_v60  ;;  %v1555_v60 = vunpack.c.h.b16 %v1518_v39 }
  0x88   :  { %1752 = vmatpush.bf16.msrb.mxu1 %v3276_v6 }
  0x8c   :  { %1753 = vmatpush.bf16.msrb.mxu1 %v3275_v23  ;;  %v1559_v23 = vpack.c.b16 %v3568_v63, %v1555_v60  ;;  %v1294_v60 = vshll.u32 %v3893_v16, 16 }
  0x8e   :  { %v1576_v39 = vshrl.u32 %v1559_v23, 16  ;;  %v1579_v44 = vshll.u32 %v1559_v23, 16 }
  0x91   :  { %953 = vmatmul.bf16.gmra.mxu2 %v3893_v16 }
  0x92   :  { %1195 = vmatmul.bf16.gmra.mxu0 %v2775_v20  ;;  %v3267_v20 = vld [vmem:[%s4449_s1 + $0x300] sm:$0xff] }
  0x93   :  { %1224 = vmatmul.bf16.gmra.mxu1 %v2779_v26  ;;  %1724 = vmatpush.bf16.msrb.mxu0 %v3267_v20 }
  0x94   :  { %982 = vmatmul.bf16.gmra.mxu3 %v3895_v18 }
  0x9e   :  { %v250_v8 = vpop.f32.mrf.mxu0 }
  0x9f   :  { %v279_v13 = vpop.f32.mrf.mxu1 }
  0xa0   :  { %v3984_v21 = vadd.f32 %v279_v13, %v250_v8  ;;  %v2795_v13 = vor.u32 %v3233_v56, %v2792_v58 }
  0xa1   :  { %958 = vmatmul.bf16.gmra.mxu2 %v3971_v7 }
  0xa2   :  { %1200 = vmatmul.bf16.gmra.mxu0 %v2783_v10  ;;  %v835_v10 = vpack.c.b16 %v827_v49, %v825_v46  ;;  %v1571_v49 = vrot.slane %v556_v1, 2 }
  0xa3   :  { %1229 = vmatmul.bf16.gmra.mxu1 %v2787_v15  ;;  %v1558_v15 = vpack.c.b16 %v3560_v59, %v1554_v52  ;;  %v1287_v52 = vshrl.u32 %v3827_v41, 16 }
  0xa4   :  { %987 = vmatmul.bf16.gmra.mxu3 %v3973_v9  ;;  %v260_v26 = vpop.f32.mrf.mxu2 }
  0xa5   :  { %v1567_v35 = vshll.u32 %v1558_v15, 16 }
  0xa6   :  { %v252_v33 = vpop.f32.mrf.mxu0 }
  0xa7   :  { %v289_v27 = vpop.f32.mrf.mxu3  ;;  %v281_v37 = vpop.f32.mrf.mxu1  ;;  %v1569_v1 = vrot.slane %v1567_v35, 3 }
  0xa8   :  { %v3991_v32 = vadd.f32 %v289_v27, %v260_v26  ;;  %v4001_v38 = vadd.f32 %v281_v37, %v252_v33  ;;  %v1289_v26 = vshll.u32 %v3827_v41, 16  ;;  %v1301_v27 = vshll.u32 %v3829_v42, 16 }
  0xa9   :  { %v1564_v33 = vshrl.u32 %v1558_v15, 16  ;;  %v1578_v41 = vrot.slane %v1576_v39, 2  ;;  %v1584_v15 = vrot.slane %v552_v36, 3 }
  0xab   :  { %v4050_v35 = vor.u32 %v1584_v15, %v1583_v50  ;;  %v3298_v50 = vld [vmem:[%s4449_s1 + $0x3f8] sm:$0xff]  ;;  %v3297_v15 = vld [vmem:[%s4449_s1 + $0x3f0] sm:$0xff] }
  0xac   :  { %v262_v54 = vpop.f32.mrf.mxu2  ;;  %2030 = vmatpush.bf16.msra.mxu3 %v3298_v50 }
  0xae   :  { %v255_v8 = vpop.f32.mrf.mxu0 }
  0xaf   :  { %v291_v61 = vpop.f32.mrf.mxu3  ;;  %v284_v12 = vpop.f32.mrf.mxu1 }
  0xb0   :  { %v4022_v6 = vadd.f32 %v291_v61, %v262_v54  ;;  %v4027_v20 = vadd.f32 %v284_v12, %v255_v8  ;;  %v1291_v54 = vrot.slane %v1289_v26, 1  ;;  %v1299_v61 = vshrl.u32 %v3829_v42, 16  ;;  %2031 = vmatpush.bf16.msra.mxu3 %v3297_v15 }
  0xb1   :  { %963 = vmatmul.bf16.gmra.mxu2 %v834_v62  ;;  %v1303_v62 = vrot.slane %v1301_v27, 1  ;;  %v1296_v26 = vrot.slane %v1294_v60, 1 }
  0xb2   :  { %1205 = vmatmul.bf16.gmra.mxu0 %v2791_v11  ;;  %v1566_v11 = vrot.slane %v1564_v33, 2  ;;  %v1292_v23 = vor.u32 %v1291_v54, %v1287_v52 }
  0xb3   :  { %1234 = vmatmul.bf16.gmra.mxu1 %v2795_v13  ;;  %v1581_v13 = vrot.slane %v1579_v44, 3 }
  0xb4   :  { %992 = vmatmul.bf16.gmra.mxu3 %v835_v10  ;;  %v265_v37 = vpop.f32.mrf.mxu2  ;;  %v1306_v10 = vshll.u32 %v3895_v18, 16  ;;  %v1570_v27 = vor.u32 %v1569_v1, %v1566_v11  ;;  %v1297_v39 = vsel %vm531_vm0, %v1292_v23, %v1296_v26  ;;  %v1310_v1 = vshrl.u32 %v3893_v16, 16  ;;  %v1783_v16 = vld [vmem:[%s4448_s0 + $0x8] sm:$0xcc] }
  0xb5   :  { %v1582_v33 = vor.u32 %v1581_v13, %v1578_v41  ;;  %v1318_v41 = vshrl.u32 %v3895_v18, 16  ;;  %v3289_v13 = vld [vmem:[%s4449_s1 + $0x3b0] sm:$0xff]  ;;  %v1322_v18 = vshll.u32 %v3973_v9, 16 }
  0xb6   :  { %v257_v58 = vpop.f32.mrf.mxu0  ;;  %v1308_v42 = vrot.slane %v1306_v10, 1 }
  0xb7   :  { %v294_v51 = vpop.f32.mrf.mxu3  ;;  %v286_v8 = vpop.f32.mrf.mxu1 }
  0xb8   :  { %v4037_v56 = vadd.f32 %v294_v51, %v265_v37  ;;  %v4044_v12 = vadd.f32 %v286_v8, %v257_v58  ;;  %v1304_v37 = vor.u32 %v1303_v62, %v1299_v61  ;;  %v4048_v51 = vor.u32 %v1572_v4, %v1571_v49  ;;  %v3306_v61 = vld [vmem:[%s4449_s1 + $0x438] sm:$0xff] }
  0xb9   :  { %v1586_v49 = vsel %vm1562_vm1, %v1582_v33, %v4050_v35  ;;  %v3314_v62 = vld [vmem:[%s4449_s1 + $0x478] sm:$0xff]  ;;  %2224 = vmatpush.bf16.msra.mxu0 %v3306_v61  ;;  %v1314_v4 = vshll.u32 %v3971_v7, 16  ;;  %v1588_v33 = vrot.slane %v560_v3, 3  ;;  %v1248_v61 = vld [vmem:[%s4448_s0 + $0xf0] sm:$0x33] }
  0xba   :  { %v1309_v36 = vsel %vm531_vm0, %v1304_v37, %v1308_v42  ;;  %v1574_v52 = vsel %vm1562_vm1, %v1570_v27, %v4048_v51  ;;  %2253 = vmatpush.bf16.msra.mxu1 %v3314_v62  ;;  %v1587_v27 = vrot.slane %v572_v45, 2  ;;  %v1320_v62 = vor.u32 %v1318_v41, %v1308_v42 }
  0xbb   :  { %v4114_v50 = vrot.slane %v1314_v4, 1  ;;  %v1282_v41 = vunpack.c.l.b16 %v1248_v61 }
  0xbc   :  { %v267_v53 = vpop.f32.mrf.mxu2 }
  0xbd   :  { %v4169_v14 = vpack.c.b16 %v1282_v41, %v824_v43  ;;  %v1334_v41 = vshrl.u32 %v3973_v9, 16  ;;  %v1853_v9 = vshrl.u32 %v3574_v2, 16 }
  0xbf   :  { %v296_v30 = vpop.f32.mrf.mxu3  ;;  %v707_v44 = vpop.f32.mrf.mxu0 }
  0xc0   :  { %v4052_v58 = vadd.f32 %v296_v30, %v267_v53  ;;  %v736_v54 = vpop.f32.mrf.mxu1  ;;  %v3290_v53 = vld [vmem:[%s4449_s1 + $0x3b8] sm:$0xff]  ;;  %v3313_v30 = vld [vmem:[%s4449_s1 + $0x470] sm:$0xff] }
  0xc1   :  { %v737_v60 = vadd.f32 %v736_v54, %v707_v44  ;;  %1460 = vmatmul.bf16.vlgmr.msrb.gmra.mxu2 %v1297_v39  ;;  %v1591_v44 = vrot.slane %v580_v47, 2  ;;  %2254 = vmatpush.bf16.msra.mxu1 %v3313_v30  ;;  %v3288_v54 = vld [vmem:[%s4449_s1 + $0x3a8] sm:$0xff] }
  0xc2   :  { %1725 = vmatmul.bf16.vlgmr.msrb.gmra.mxu0 %v1574_v52  ;;  %2001 = vmatpush.bf16.msra.mxu2 %v3290_v53  ;;  %v1519_v52 = vld [vmem:[%s4448_s0 + $0xe0] sm:$0xff]  ;;  %v3296_v47 = vld [vmem:[%s4449_s1 + $0x3e8] sm:$0xff]  ;;  %v1312_v53 = vor.u32 %v1310_v1, %v1296_v26 }
  0xc3   :  { %1754 = vmatmul.bf16.vlgmr.msrb.gmra.mxu1 %v1586_v49  ;;  %v1819_v49 = vunpack.c.l.b16 %v1783_v16  ;;  %v1557_v26 = vunpack.c.h.b16 %v1519_v52  ;;  %2032 = vmatpush.bf16.msra.mxu3 %v3296_v47 }
  0xc4   :  { %1489 = vmatmul.bf16.vlgmr.msrb.gmra.mxu3 %v1309_v36  ;;  %v444_v8 = vpop.f32.mrf.mxu2  ;;  %v1592_v36 = vrot.slane %v568_v5, 3  ;;  %v3304_v5 = vld [vmem:[%s4449_s1 + $0x428] sm:$0xff] }
  0xc5   :  { %v445_v10 = vadd.f32 %v444_v8, %v3984_v21  ;;  %v3305_v21 = vld [vmem:[%s4449_s1 + $0x430] sm:$0xff]  ;;  %v4122_v8 = vrot.slane %v1322_v18, 1  ;;  %v4131_v42 = vpack.c.b16 %v115_v17, %v1819_v49  ;;  %v3303_v18 = vld [vmem:[%s4449_s1 + $0x420] sm:$0xff] }
  0xc6   :  { %2002 = vmatpush.bf16.msra.mxu2 %v3289_v13  ;;  %2225 = vmatpush.bf16.msra.mxu0 %v3305_v21  ;;  %v1820_v13 = vunpack.c.h.b16 %v1783_v16  ;;  %v4126_v21 = vor.u32 %v1592_v36, %v1591_v44  ;;  %v1317_v16 = vsel %vm531_vm0, %v1312_v53, %v4114_v50 }
  0xc7   :  { %v473_v11 = vpop.f32.mrf.mxu3  ;;  %v709_v37 = vpop.f32.mrf.mxu0  ;;  %v1831_v53 = vshll.u32 %v4131_v42, 16 }
  0xc8   :  { %v474_v23 = vadd.f32 %v473_v11, %v445_v10  ;;  %v738_v39 = vpop.f32.mrf.mxu1  ;;  %v4124_v10 = vor.u32 %v1588_v33, %v1587_v27  ;;  %v1556_v11 = vunpack.c.l.b16 %v1519_v52  ;;  %v1325_v33 = vsel %vm531_vm0, %v1320_v62, %v4122_v8 }
  0xc9   :  { %v739_v3 = vadd.f32 %v738_v39, %v709_v37  ;;  %v3287_v37 = vld [vmem:[%s4449_s1 + $0x3a0] sm:$0xff]  ;;  %v4154_v44 = vpack.c.b16 %v116_v22, %v1820_v13  ;;  %v1594_v52 = vsel %vm1562_vm1, %v4050_v35, %v4126_v21  ;;  %v3286_v22 = vld [vmem:[%s4449_s1 + $0x398] sm:$0xff]  ;;  %v1836_v13 = vshrl.u32 %v3570_v0, 16 }
  0xca   :  { %v4103_v45 = vadd.f32 %v737_v60, %v474_v23  ;;  %v3312_v60 = vld [vmem:[%s4449_s1 + $0x468] sm:$0xff]  ;;  %2003 = vmatpush.bf16.msra.mxu2 %v3288_v54  ;;  %2226 = vmatpush.bf16.msra.mxu0 %v3304_v5  ;;  %v1283_v23 = vunpack.c.h.b16 %v1248_v61  ;;  %v1590_v30 = vsel %vm1562_vm1, %v4048_v51, %v4124_v10  ;;  %v4150_v39 = vpack.c.b16 %v1556_v11, %v3728_v25  ;;  %v3311_v51 = vld [vmem:[%s4449_s1 + $0x460] sm:$0xff]  ;;  %v3302_v35 = vld [vmem:[%s4449_s1 + $0x418] sm:$0xff] }
  0xcb   :  { %2255 = vmatpush.bf16.msra.mxu1 %v3312_v60  ;;  %v4160_v54 = vpack.c.b16 %v1557_v26, %v3731_v28  ;;  %v3294_v28 = vld [vmem:[%s4449_s1 + $0x3d8] sm:$0xff]  ;;  %v1845_v60 = vshrl.u32 %v4154_v44, 16 }
  0xcc   :  { %v446_v15 = vpop.f32.mrf.mxu2  ;;  %v4183_v43 = vpack.c.b16 %v1283_v23, %v825_v46  ;;  %v1596_v5 = vshrl.u32 %v4150_v39, 16  ;;  %v1599_v49 = vshll.u32 %v4150_v39, 16  ;;  %v1848_v46 = vshll.u32 %v4154_v44, 16  ;;  %v3285_v23 = vld [vmem:[%s4449_s1 + $0x390] sm:$0xff] }
  0xcd   :  { %v447_v1 = vadd.f32 %v446_v15, %v4001_v38  ;;  %v3295_v38 = vld [vmem:[%s4449_s1 + $0x3e0] sm:$0xff]  ;;  %v1605_v62 = vshrl.u32 %v4160_v54, 16  ;;  %v1608_v11 = vshll.u32 %v4160_v54, 16  ;;  %v1839_v15 = vshll.u32 %v3570_v0, 16  ;;  %v3301_v0 = vld [vmem:[%s4449_s1 + $0x410] sm:$0xff] }
  0xce   :  { %2004 = vmatpush.bf16.msra.mxu2 %v3287_v37  ;;  %2033 = vmatpush.bf16.msra.mxu3 %v3295_v38  ;;  %v1598_v38 = vrot.slane %v1596_v5, 2  ;;  %v3309_v44 = vld [vmem:[%s4449_s1 + $0x450] sm:$0xff]  ;;  %v1847_v5 = vrot.slane %v1845_v60, 2 }
  0xcf   :  { %v475_v4 = vpop.f32.mrf.mxu3  ;;  %v712_v17 = vpop.f32.mrf.mxu0  ;;  %2227 = vmatpush.bf16.msra.mxu0 %v3303_v18  ;;  %2256 = vmatpush.bf16.msra.mxu1 %v3311_v51  ;;  %v1601_v18 = vrot.slane %v1599_v49, 3 }
  0xd0   :  { %v476_v27 = vadd.f32 %v475_v4, %v447_v1  ;;  %v741_v36 = vpop.f32.mrf.mxu1  ;;  %v1326_v4 = vshrl.u32 %v3971_v7, 16  ;;  %v1338_v7 = vshll.u32 %v4183_v43, 16 }
  0xd1   :  { %v742_v47 = vadd.f32 %v741_v36, %v712_v17  ;;  %1465 = vmatmul.bf16.gmra.mxu2 %v1317_v16  ;;  %v3293_v16 = vld [vmem:[%s4449_s1 + $0x3d0] sm:$0xff] }
  0xd2   :  { %v4165_v25 = vadd.f32 %v739_v3, %v476_v27  ;;  %1730 = vmatmul.bf16.gmra.mxu0 %v1590_v30  ;;  %v1828_v3 = vshrl.u32 %v4131_v42, 16  ;;  %2005 = vmatpush.bf16.msra.mxu2 %v3286_v22  ;;  %v1330_v42 = vshll.u32 %v4169_v14, 16  ;;  %v1856_v27 = vshll.u32 %v3574_v2, 16  ;;  %v3284_v2 = vld [vmem:[%s4449_s1 + $0x388] sm:$0xff] }
  0xd3   :  { %1759 = vmatmul.bf16.gmra.mxu1 %v1594_v52  ;;  %2034 = vmatpush.bf16.msra.mxu3 %v3294_v28  ;;  %v1610_v30 = vrot.slane %v1608_v11, 3  ;;  %v1833_v52 = vrot.slane %v1831_v53, 3  ;;  %v3292_v28 = vld [vmem:[%s4449_s1 + $0x3c8] sm:$0xff]  ;;  %v1838_v53 = vrot.slane %v1836_v13, 2  ;;  %v4231_v11 = vor.u32 %v1601_v18, %v1598_v38  ;;  %v3307_v18 = vld [vmem:[%s4449_s1 + $0x440] sm:$0xff] }
  0xd4   :  { %1494 = vmatmul.bf16.gmra.mxu3 %v1325_v33  ;;  %v449_v61 = vpop.f32.mrf.mxu2  ;;  %2228 = vmatpush.bf16.msra.mxu0 %v3302_v35  ;;  %v1607_v33 = vrot.slane %v1605_v62, 2  ;;  %v1830_v36 = vrot.slane %v1828_v3, 2  ;;  %v3300_v35 = vld [vmem:[%s4449_s1 + $0x408] sm:$0xff]  ;;  %v1850_v3 = vrot.slane %v1848_v46, 3  ;;  %v4228_v49 = vrot.slane %v1330_v42, 1  ;;  %v3291_v42 = vld [vmem:[%s4449_s1 + $0x3c0] sm:$0xff] }
  0xd5   :  { %v450_v26 = vadd.f32 %v449_v61, %v4027_v20  ;;  %2257 = vmatpush.bf16.msra.mxu1 %v3310_v34  ;;  %v1336_v61 = vor.u32 %v1334_v41, %v4122_v8  ;;  %v1340_v62 = vrot.slane %v1338_v7, 1  ;;  %v1841_v34 = vrot.slane %v1839_v15, 3 }
  0xd6   :  { %2006 = vmatpush.bf16.msra.mxu2 %v3285_v23  ;;  %v1834_v8 = vor.u32 %v1833_v52, %v1830_v36  ;;  %v1851_v13 = vor.u32 %v1850_v3, %v1847_v5  ;;  %v1342_v5 = vshrl.u32 %v4169_v14, 16  ;;  %v1345_v3 = vshrl.u32 %v4183_v43, 16 }
  0xd7   :  { %v478_v1 = vpop.f32.mrf.mxu3  ;;  %v714_v37 = vpop.f32.mrf.mxu0  ;;  %2035 = vmatpush.bf16.msra.mxu3 %v3293_v16  ;;  %v4233_v16 = vor.u32 %v1610_v30, %v1607_v33 }
  0xd8   :  { %v479_v20 = vadd.f32 %v478_v1, %v450_v26  ;;  %v743_v17 = vpop.f32.mrf.mxu1  ;;  %2229 = vmatpush.bf16.msra.mxu0 %v3301_v0  ;;  %v1855_v26 = vrot.slane %v1853_v9, 2  ;;  %v1858_v1 = vrot.slane %v1856_v27, 3  ;;  %v1842_v9 = vor.u32 %v1841_v34, %v1838_v53 }
  0xd9   :  { %v744_v22 = vadd.f32 %v743_v17, %v714_v37  ;;  %2258 = vmatpush.bf16.msra.mxu1 %v3309_v44  ;;  %v3299_v37 = vld [vmem:[%s4449_s1 + $0x400] sm:$0xff]  ;;  %v1612_v38 = vsel %vm1562_vm1, %v4126_v21, %v4233_v16  ;;  %v1865_v53 = vshll.u32 %v3482_v29, 16  ;;  %v1874_v34 = vshll.u32 %v3486_v31, 16 }
  0xda   :  { %v4216_v51 = vadd.f32 %v742_v47, %v479_v20  ;;  %v1328_v47 = vor.u32 %v1326_v4, %v4114_v50  ;;  %2007 = vmatpush.bf16.msra.mxu2 %v3284_v2  ;;  %v3308_v50 = vld [vmem:[%s4449_s1 + $0x448] sm:$0xff]  ;;  %v3283_v4 = vld [vmem:[%s4449_s1 + $0x380] sm:$0xff]  ;;  %v1603_v20 = vsel %vm1562_vm1, %v4124_v10, %v4231_v11  ;;  %v1859_v27 = vor.u32 %v1858_v1, %v1855_v26  ;;  %s2441_s1 = sshll.u32 %s3368_s18, 4  ;;  %s2442_s1 = int_to_ptr.vmem [resolvable:$true] %s2441_s1 }
  0xdb   :  { %2036 = vmatpush.bf16.msra.mxu3 %v3292_v28  ;;  %v4263_v33 = vsel %vm1562_vm1, %v1834_v8, %v1842_v9  ;;  %v1344_v14 = vor.u32 %v1342_v5, %v4228_v49  ;;  %v1347_v43 = vor.u32 %v1345_v3, %v1340_v62 }
  0xdc   :  { %v451_v23 = vpop.f32.mrf.mxu2  ;;  %2230 = vmatpush.bf16.msra.mxu0 %v3300_v35  ;;  %v1333_v15 = vsel %vm531_vm0, %v1328_v47, %v4228_v49  ;;  %v4266_v21 = vsel %vm1562_vm1, %v1851_v13, %v1859_v27  ;;  %v1862_v47 = vshrl.u32 %v3482_v29, 16  ;;  %v1876_v29 = vrot.slane %v1874_v34, 3 }
  0xdd   :  { %v452_v60 = vadd.f32 %v451_v23, %v4044_v12  ;;  %v1341_v12 = vsel %vm531_vm0, %v1336_v61, %v1340_v62  ;;  %2259 = vmatpush.bf16.msra.mxu1 %v3308_v50  ;;  %v1871_v61 = vshrl.u32 %v3486_v31, 16 }
  0xde   :  { %2008 = vmatpush.bf16.msra.mxu2 %v3283_v4 }
  0xdf   :  { %v480_v46 = vpop.f32.mrf.mxu3  ;;  %v717_v0 = vpop.f32.mrf.mxu0  ;;  %2037 = vmatpush.bf16.msra.mxu3 %v3291_v42  ;;  %v1873_v8 = vrot.slane %v1871_v61, 2  ;;  %v2067_v42 = vld [vmem:[%s4448_s0] sm:$0x88] }
  0xe0   :  { %v481_v41 = vadd.f32 %v480_v46, %v452_v60  ;;  %v746_v7 = vpop.f32.mrf.mxu1  ;;  %2231 = vmatpush.bf16.msra.mxu0 %v3299_v37  ;;  %v1864_v60 = vrot.slane %v1862_v47, 2  ;;  %v1867_v46 = vrot.slane %v1865_v53, 3  ;;  %v4456_v37 = vunpack.c.h.b16 %v3517_v40 }
  0xe1   :  { %v747_v10 = vadd.f32 %v746_v7, %v717_v0  ;;  %1470 = vmatmul.bf16.gmra.mxu2 %v1333_v15  ;;  %2260 = vmatpush.bf16.msra.mxu1 %v3307_v18  ;;  %v1877_v0 = vor.u32 %v1876_v29, %v1873_v8 }
  0xe2   :  { %v4260_v17 = vadd.f32 %v744_v22, %v481_v41  ;;  %1735 = vmatmul.bf16.gmra.mxu0 %v1603_v20  ;;  %v1868_v41 = vor.u32 %v1867_v46, %v1864_v60 }
  0xe3   :  { %1764 = vmatmul.bf16.gmra.mxu1 %v1612_v38  ;;  %v4294_v20 = vsel %vm1562_vm1, %v1859_v27, %v1877_v0  ;;  %v2101_v38 = vunpack.c.l.b16 %v2067_v42 }
  0xe4   :  { %1499 = vmatmul.bf16.gmra.mxu3 %v1341_v12  ;;  %v454_v30 = vpop.f32.mrf.mxu2  ;;  %v4291_v62 = vsel %vm1562_vm1, %v1842_v9, %v1868_v41 }
  0xe5   :  { %v455_v44 = vadd.f32 %v454_v30, %v3991_v32  ;;  %v1784_v32 = vld [vmem:[%s4448_s0 + $0xe8] sm:$0xff] }
  0xe6   :  { %v1821_v1 = vunpack.c.l.b16 %v1784_v32  ;;  %v1822_v13 = vunpack.c.h.b16 %v1784_v32 }
  0xe7   :  { %v483_v36 = vpop.f32.mrf.mxu3  ;;  %v719_v22 = vpop.f32.mrf.mxu0 }
  0xe8   :  { %v484_v52 = vadd.f32 %v483_v36, %v455_v44  ;;  %v748_v2 = vpop.f32.mrf.mxu1  ;;  %v1825_v49 = vpack.c.b16 %v1821_v1, %v125_v48  ;;  %v1826_v7 = vpack.c.b16 %v1822_v13, %v4456_v37  ;;  %v2114_v37 = vrot.slane %v3674_v57, 3 }
  0xe9   :  { %v749_v35 = vadd.f32 %v748_v2, %v719_v22  ;;  %v2103_v22 = vpack.c.b16 %v3560_v59, %v2101_v38 }
  0xea   :  { %v4269_v28 = vadd.f32 %v747_v10, %v484_v52  ;;  %v2102_v10 = vunpack.c.h.b16 %v2067_v42  ;;  %v1880_v44 = vshrl.u32 %v1825_v49, 16  ;;  %v1883_v36 = vshll.u32 %v1825_v49, 16 }
  0xeb   :  { %v1892_v27 = vshll.u32 %v1826_v7, 16  ;;  %v2106_v53 = vrot.slane %v2103_v22, 3  ;;  %v2116_v22 = vrot.slane %v4150_v39, 3 }
  0xec   :  { %v456_v26 = vpop.f32.mrf.mxu2  ;;  %v2104_v40 = vpack.c.b16 %v3568_v63, %v2102_v10  ;;  %v1882_v5 = vrot.slane %v1880_v44, 2  ;;  %v1885_v3 = vrot.slane %v1883_v36, 3 }
  0xed   :  { %v457_v23 = vadd.f32 %v456_v26, %v4022_v6  ;;  %v1894_v61 = vrot.slane %v1892_v27, 3  ;;  %v2110_v26 = vrot.slane %v3620_v24, 3 }
  0xee   :  { %v2109_v32 = vrot.slane %v2104_v40, 3  ;;  %v4309_v60 = vor.u32 %v1885_v3, %v1882_v5 }
  0xef   :  { %v485_v50 = vpop.f32.mrf.mxu3  ;;  %v722_v4 = vpop.f32.mrf.mxu0 }
  0xf0   :  { %v486_v15 = vadd.f32 %v485_v50, %v457_v23  ;;  %v751_v31 = vpop.f32.mrf.mxu1  ;;  %v1887_v24 = vsel %vm1562_vm1, %v1868_v41, %v4309_v60 }
  0xf1   :  { %v752_v6 = vadd.f32 %v751_v31, %v722_v4  ;;  %1475 = vmatmul.bf16.gmra.mxu2 %v1344_v14 }
  0xf2   :  { %v4285_v12 = vadd.f32 %v749_v35, %v486_v15  ;;  %1740 = vmatmul.bf16.gmra.mxu0 %v4231_v11  ;;  %v1889_v11 = vshrl.u32 %v1826_v7, 16 }
  0xf3   :  { %1769 = vmatmul.bf16.gmra.mxu1 %v4233_v16 }
  0xf4   :  { %1504 = vmatmul.bf16.gmra.mxu3 %v1347_v43  ;;  %v459_v18 = vpop.f32.mrf.mxu2  ;;  %v1891_v47 = vrot.slane %v1889_v11, 2  ;;  %v2111_v43 = vsel %vm2105_vm2, %v2109_v32, %v2110_v26 }
  0xf5   :  { %v460_v30 = vadd.f32 %v459_v18, %v4037_v56  ;;  %v2107_v56 = vrot.slane %v3612_v19, 3 }
  0xf6   :  { %v4311_v46 = vor.u32 %v1894_v61, %v1891_v47 }
  0xf7   :  { %v488_v48 = vpop.f32.mrf.mxu3  ;;  %v724_v9 = vpop.f32.mrf.mxu0  ;;  %v2108_v50 = vsel %vm2105_vm2, %v2106_v53, %v2107_v56 }
  0xf8   :  { %v489_v52 = vadd.f32 %v488_v48, %v460_v30  ;;  %v753_v2 = vpop.f32.mrf.mxu1  ;;  %v2115_v30 = vsel %vm2105_vm2, %v2110_v26, %v2114_v37 }
  0xf9   :  { %v754_v16 = vadd.f32 %v753_v2, %v724_v9 }
  0xfa   :  { %v4302_v35 = vadd.f32 %v752_v6, %v489_v52 }
  0xfc   :  { %v461_v34 = vpop.f32.mrf.mxu2 }
  0xfd   :  { %v462_v59 = vadd.f32 %v461_v34, %v4052_v58  ;;  %v1896_v58 = vsel %vm1562_vm1, %v1877_v0, %v4311_v46 }
  0xff   :  { %v490_v1 = vpop.f32.mrf.mxu3  ;;  %v1191_v63 = vpop.f32.mrf.mxu0 }
 0x100   :  { %v491_v23 = vadd.f32 %v490_v1, %v462_v59  ;;  %v1220_v14 = vpop.f32.mrf.mxu1 }
 0x101   :  { %v1221_v8 = vadd.f32 %v1220_v14, %v1191_v63  ;;  %2009 = vmatmul.bf16.vlgmr.msra.gmra.mxu2 %v4263_v33  ;;  %v2112_v33 = vrot.slane %v3669_v55, 3 }
 0x102   :  { %v4313_v19 = vadd.f32 %v754_v16, %v491_v23  ;;  %2232 = vmatmul.bf16.vlgmr.msra.gmra.mxu0 %v2108_v50 }
 0x103   :  { %2261 = vmatmul.bf16.vlgmr.msra.gmra.mxu1 %v2111_v43  ;;  %v2113_v0 = vsel %vm2105_vm2, %v2107_v56, %v2112_v33  ;;  %v2117_v16 = vsel %vm2105_vm2, %v2112_v33, %v2116_v22 }
 0x104   :  { %2038 = vmatmul.bf16.vlgmr.msra.gmra.mxu3 %v4266_v21  ;;  %v949_v29 = vpop.f32.mrf.mxu2 }
 0x107   :  { %v978_v13 = vpop.f32.mrf.mxu3  ;;  %v1193_v4 = vpop.f32.mrf.mxu0 }
 0x108   :  { %v979_v15 = vadd.f32 %v978_v13, %v949_v29  ;;  %v1222_v42 = vpop.f32.mrf.mxu1 }
 0x109   :  { %v1223_v6 = vadd.f32 %v1222_v42, %v1193_v4 }
 0x10a   :  { %v998_v31 = vadd.f32 %v979_v15, %v4103_v45 }
 0x10c   :  { %v4322_v49 = vadd.f32 %v1221_v8, %v998_v31  ;;  %v951_v21 = vpop.f32.mrf.mxu2 }
 0x10f   :  { %v980_v41 = vpop.f32.mrf.mxu3  ;;  %v1196_v38 = vpop.f32.mrf.mxu0 }
 0x110   :  { %v981_v7 = vadd.f32 %v980_v41, %v951_v21  ;;  %v1225_v10 = vpop.f32.mrf.mxu1 }
 0x111   :  { %v1226_v45 = vadd.f32 %v1225_v10, %v1196_v38  ;;  %2014 = vmatmul.bf16.gmra.mxu2 %v4291_v62  ;;  %v2118_v62 = vrot.slane %v4160_v54, 3 }
 0x112   :  { %v999_v18 = vadd.f32 %v981_v7, %v4165_v25  ;;  %2237 = vmatmul.bf16.gmra.mxu0 %v2113_v0 }
 0x113   :  { %2266 = vmatmul.bf16.gmra.mxu1 %v2115_v30  ;;  %v2119_v47 = vsel %vm2105_vm2, %v2114_v37, %v2118_v62 }
 0x114   :  { %2043 = vmatmul.bf16.gmra.mxu3 %v4294_v20  ;;  %v4331_v55 = vadd.f32 %v1223_v6, %v999_v18  ;;  %v954_v57 = vpop.f32.mrf.mxu2 }
 0x117   :  { %v983_v48 = vpop.f32.mrf.mxu3  ;;  %v1198_v36 = vpop.f32.mrf.mxu0 }
 0x118   :  { %v984_v44 = vadd.f32 %v983_v48, %v954_v57  ;;  %v1227_v52 = vpop.f32.mrf.mxu1 }
 0x119   :  { %v1228_v25 = vadd.f32 %v1227_v52, %v1198_v36 }
 0x11a   :  { %v1000_v11 = vadd.f32 %v984_v44, %v4216_v51 }
 0x11c   :  { %v4334_v9 = vadd.f32 %v1226_v45, %v1000_v11  ;;  %v956_v27 = vpop.f32.mrf.mxu2 }
 0x11f   :  { %v985_v20 = vpop.f32.mrf.mxu3  ;;  %v1201_v40 = vpop.f32.mrf.mxu0 }
 0x120   :  { %v986_v2 = vadd.f32 %v985_v20, %v956_v27  ;;  %v1230_v3 = vpop.f32.mrf.mxu1 }
 0x121   :  { %v1231_v51 = vadd.f32 %v1230_v3, %v1201_v40  ;;  %2019 = vmatmul.bf16.gmra.mxu2 %v1887_v24 }
 0x122   :  { %v1001_v5 = vadd.f32 %v986_v2, %v4260_v17  ;;  %2242 = vmatmul.bf16.gmra.mxu0 %v2117_v16 }
 0x123   :  { %2271 = vmatmul.bf16.gmra.mxu1 %v2119_v47 }
 0x124   :  { %2048 = vmatmul.bf16.gmra.mxu3 %v1896_v58  ;;  %v4341_v53 = vadd.f32 %v1228_v25, %v1001_v5  ;;  %v959_v39 = vpop.f32.mrf.mxu2 }
 0x127   :  { %v988_v56 = vpop.f32.mrf.mxu3  ;;  %v1203_v61 = vpop.f32.mrf.mxu0 }
 0x128   :  { %v989_v54 = vadd.f32 %v988_v56, %v959_v39  ;;  %v1232_v32 = vpop.f32.mrf.mxu1 }
 0x129   :  { %v1233_v26 = vadd.f32 %v1232_v32, %v1203_v61 }
 0x12a   :  { %v1002_v34 = vadd.f32 %v989_v54, %v4269_v28 }
 0x12c   :  { %v4344_v59 = vadd.f32 %v1231_v51, %v1002_v34  ;;  %v961_v17 = vpop.f32.mrf.mxu2 }
 0x12f   :  { %v990_v1 = vpop.f32.mrf.mxu3  ;;  %v1206_v63 = vpop.f32.mrf.mxu0 }
 0x130   :  { %v991_v23 = vadd.f32 %v990_v1, %v961_v17  ;;  %v1235_v14 = vpop.f32.mrf.mxu1 }
 0x131   :  { %v1236_v43 = vadd.f32 %v1235_v14, %v1206_v63  ;;  %2024 = vmatmul.bf16.gmra.mxu2 %v4309_v60 }
 0x132   :  { %v1003_v50 = vadd.f32 %v991_v23, %v4285_v12  ;;  %2247 = vmatmul.bf16.gmra.mxu0 %v2116_v22 }
 0x133   :  { %2276 = vmatmul.bf16.gmra.mxu1 %v2118_v62 }
 0x134   :  { %2053 = vmatmul.bf16.gmra.mxu3 %v4311_v46  ;;  %v1245_v8 = vadd.f32 %v1233_v26, %v1003_v50  ;;  %v964_v28 = vpop.f32.mrf.mxu2 }
 0x137   :  { %v993_v24 = vpop.f32.mrf.mxu3  ;;  %v1208_v29 = vpop.f32.mrf.mxu0 }
 0x138   :  { %v994_v58 = vadd.f32 %v993_v24, %v964_v28  ;;  %v1237_v15 = vpop.f32.mrf.mxu1 }
 0x139   :  { %v1238_v4 = vadd.f32 %v1237_v15, %v1208_v29 }
 0x13a   :  { %v1004_v13 = vadd.f32 %v994_v58, %v4302_v35 }
 0x13c   :  { %v1246_v31 = vadd.f32 %v1236_v43, %v1004_v13  ;;  %v966_v42 = vpop.f32.mrf.mxu2 }
 0x13f   :  { %v995_v12 = vpop.f32.mrf.mxu3  ;;  %v1726_v33 = vpop.f32.mrf.mxu0 }
 0x140   :  { %v996_v6 = vadd.f32 %v995_v12, %v966_v42  ;;  %v1755_v21 = vpop.f32.mrf.mxu1 }
 0x141   :  { %v1756_v46 = vadd.f32 %v1755_v21, %v1726_v33 }
 0x142   :  { %v1005_v60 = vadd.f32 %v996_v6, %v4313_v19 }
 0x144   :  { %v4351_v37 = vadd.f32 %v1238_v4, %v1005_v60  ;;  %v1461_v41 = vpop.f32.mrf.mxu2 }
 0x147   :  { %v1490_v7 = vpop.f32.mrf.mxu3  ;;  %v1728_v0 = vpop.f32.mrf.mxu0 }
 0x148   :  { %v1491_v38 = vadd.f32 %v1490_v7, %v1461_v41  ;;  %v1757_v35 = vpop.f32.mrf.mxu1 }
 0x149   :  { %v1758_v10 = vadd.f32 %v1757_v35, %v1728_v0 }
 0x14a   :  { %v1510_v18 = vadd.f32 %v1491_v38, %v4322_v49 }
 0x14c   :  { %v1775_v30 = vadd.f32 %v1756_v46, %v1510_v18  ;;  %v1463_v45 = vpop.f32.mrf.mxu2 }
 0x14f   :  { %v1492_v57 = vpop.f32.mrf.mxu3  ;;  %v1731_v44 = vpop.f32.mrf.mxu0 }
 0x150   :  { %v1493_v48 = vadd.f32 %v1492_v57, %v1463_v45  ;;  %v1760_v19 = vpop.f32.mrf.mxu1 }
 0x151   :  { %v1761_v11 = vadd.f32 %v1760_v19, %v1731_v44 }
 0x152   :  { %v1511_v36 = vadd.f32 %v1493_v48, %v4331_v55 }
 0x154   :  { %v1776_v52 = vadd.f32 %v1758_v10, %v1511_v36  ;;  %v1466_v25 = vpop.f32.mrf.mxu2 }
 0x157   :  { %v1495_v22 = vpop.f32.mrf.mxu3  ;;  %v1733_v62 = vpop.f32.mrf.mxu0 }
 0x158   :  { %v1496_v27 = vadd.f32 %v1495_v22, %v1466_v25  ;;  %v1762_v2 = vpop.f32.mrf.mxu1 }
 0x159   :  { %v1763_v49 = vadd.f32 %v1762_v2, %v1733_v62 }
 0x15a   :  { %v1512_v20 = vadd.f32 %v1496_v27, %v4334_v9 }
 0x15c   :  { %v4356_v40 = vadd.f32 %v1761_v11, %v1512_v20  ;;  %v1468_v16 = vpop.f32.mrf.mxu2 }
 0x15f   :  { %v1497_v5 = vpop.f32.mrf.mxu3  ;;  %v1736_v47 = vpop.f32.mrf.mxu0 }
 0x160   :  { %v1498_v3 = vadd.f32 %v1497_v5, %v1468_v16  ;;  %v1765_v55 = vpop.f32.mrf.mxu1 }
 0x161   :  { %v1766_v39 = vadd.f32 %v1765_v55, %v1736_v47 }
 0x162   :  { %v1513_v51 = vadd.f32 %v1498_v3, %v4341_v53 }
 0x164   :  { %v4359_v56 = vadd.f32 %v1763_v49, %v1513_v51  ;;  %v1471_v54 = vpop.f32.mrf.mxu2 }
 0x167   :  { %v1500_v61 = vpop.f32.mrf.mxu3  ;;  %v1738_v32 = vpop.f32.mrf.mxu0 }
 0x168   :  { %v1501_v34 = vadd.f32 %v1500_v61, %v1471_v54  ;;  %v1767_v26 = vpop.f32.mrf.mxu1 }
 0x169   :  { %v1768_v17 = vadd.f32 %v1767_v26, %v1738_v32 }
 0x16a   :  { %v1514_v9 = vadd.f32 %v1501_v34, %v4344_v59 }
 0x16c   :  { %v4362_v1 = vadd.f32 %v1766_v39, %v1514_v9  ;;  %v1473_v23 = vpop.f32.mrf.mxu2 }
 0x16f   :  { %v1502_v63 = vpop.f32.mrf.mxu3  ;;  %v1741_v14 = vpop.f32.mrf.mxu0 }
 0x170   :  { %v1503_v50 = vadd.f32 %v1502_v63, %v1473_v23  ;;  %v1770_v53 = vpop.f32.mrf.mxu1 }
 0x171   :  { %v1771_v28 = vadd.f32 %v1770_v53, %v1741_v14 }
 0x172   :  { %v1515_v43 = vadd.f32 %v1503_v50, %v1245_v8 }
 0x174   :  { %v4364_v24 = vadd.f32 %v1768_v17, %v1515_v43  ;;  %v1476_v58 = vpop.f32.mrf.mxu2 }
 0x177   :  { %v1505_v29 = vpop.f32.mrf.mxu3  ;;  %v4366_v15 = vpop.f32.mrf.mxu0 }
 0x178   :  { %v1506_v13 = vadd.f32 %v1505_v29, %v1476_v58  ;;  %v4368_v59 = vpop.f32.mrf.mxu1 }
 0x17a   :  { %v1516_v4 = vadd.f32 %v1506_v13, %v1246_v31  ;;  %v4379_v31 = vld [vmem:[%s4450_s2] ss:$0 sm:$0xff] }
 0x17c   :  { %v4370_v42 = vadd.f32 %v1771_v28, %v1516_v4  ;;  %v4372_v12 = vpop.f32.mrf.mxu2 }
 0x17f   :  { %v4374_v6 = vpop.f32.mrf.mxu3  ;;  %v2233_v33 = vpop.f32.mrf.mxu0 }
 0x180   :  { %v2262_v8 = vpop.f32.mrf.mxu1 }
 0x181   :  { %v2263_v60 = vadd.f32 %v2262_v8, %v2233_v33 }
 0x184   :  { %v2010_v21 = vpop.f32.mrf.mxu2 }
 0x187   :  { %v2039_v46 = vpop.f32.mrf.mxu3  ;;  %v2235_v7 = vpop.f32.mrf.mxu0 }
 0x188   :  { %v2040_v41 = vadd.f32 %v2039_v46, %v2010_v21  ;;  %v2264_v0 = vpop.f32.mrf.mxu1 }
 0x189   :  { %v2265_v44 = vadd.f32 %v2264_v0, %v2235_v7 }
 0x18a   :  { %v2059_v38 = vadd.f32 %v2040_v41, %v1775_v30 }
 0x18c   :  { %v2282_v18 = vadd.f32 %v2263_v60, %v2059_v38  ;;  %v2012_v35 = vpop.f32.mrf.mxu2 }
 0x18e   :  { %v2294_v48 = vadd.f32 %v4379_v31, %v2282_v18 }
 0x18f   :  { %v2041_v10 = vpop.f32.mrf.mxu3  ;;  %v2238_v57 = vpop.f32.mrf.mxu0 }
 0x190   :  { %v2042_v45 = vadd.f32 %v2041_v10, %v2012_v35  ;;  %v2267_v19 = vpop.f32.mrf.mxu1  ;;  %v2310_v22 = vmul.f32 0.01, %v2294_v48  ;;  %vm2302_vm3 = vcmp.gt.f32.partialorder %v2294_v48, 0.0 }
 0x191   :  { %v2268_v49 = vadd.f32 %v2267_v19, %v2238_v57  ;;  %v1508_v57 = vadd.f32 %v4374_v6, %v4372_v12 }
 0x192   :  { %v2060_v36 = vadd.f32 %v2042_v45, %v1776_v52  ;;  %v4384_v3 = vsel %vm2302_vm3, %v2294_v48, %v2310_v22  ;;  %v3322_v22 = vld [vmem:[%s4451_s3 + $0x38] sm:$0xff] }
 0x193   :  { %2422 = vmatpush.bf16.msrb.mxu3 %v3322_v22 }
 0x194   :  { %v2283_v11 = vadd.f32 %v2265_v44, %v2060_v36  ;;  %v2015_v30 = vpop.f32.mrf.mxu2 }
 0x196   :  { %v2295_v25 = vadd.f32 %v4379_v31, %v2283_v11 }
 0x197   :  { %v2044_v27 = vpop.f32.mrf.mxu3  ;;  %v2240_v2 = vpop.f32.mrf.mxu0 }
 0x198   :  { %v2045_v62 = vadd.f32 %v2044_v27, %v2015_v30  ;;  %vm2303_vm4 = vcmp.gt.f32.partialorder %v2295_v25, 0.0  ;;  %v2311_v20 = vmul.f32 0.01, %v2295_v25  ;;  %v2269_v5 = vpop.f32.mrf.mxu1  ;;  %v1517_v30 = vadd.f32 %v1508_v57, %v4351_v37 }
 0x199   :  { %v2270_v32 = vadd.f32 %v2269_v5, %v2240_v2  ;;  %v1773_v27 = vadd.f32 %v4368_v59, %v4366_v15  ;;  %v3320_v15 = vld [vmem:[%s4451_s3 + $0x28] sm:$0xff] }
 0x19a   :  { %v2061_v16 = vadd.f32 %v2045_v62, %v4356_v40  ;;  %v4386_v47 = vsel %vm2303_vm4, %v2295_v25, %v2311_v20 }
 0x19b   :  { %v2327_v52 = vpack.c.bf16 %v4386_v47, %v4384_v3  ;;  %v3341_v3 = vld [vmem:[%s4452_s4] ss:$0 sm:$0xff] }
 0x19c   :  { %v2284_v51 = vadd.f32 %v2268_v49, %v2061_v16  ;;  %v2017_v55 = vpop.f32.mrf.mxu2  ;;  %v1782_v49 = vadd.f32 %v1773_v27, %v1517_v30 }
 0x19e   :  { %v2296_v34 = vadd.f32 %v4379_v31, %v2284_v51 }
 0x19f   :  { %v2046_v39 = vpop.f32.mrf.mxu3  ;;  %v2243_v61 = vpop.f32.mrf.mxu0 }
 0x1a0   :  { %v2047_v54 = vadd.f32 %v2046_v39, %v2017_v55  ;;  %v2272_v26 = vpop.f32.mrf.mxu1  ;;  %v2312_v63 = vmul.f32 0.01, %v2296_v34  ;;  %vm2304_vm5 = vcmp.gt.f32.partialorder %v2296_v34, 0.0 }
 0x1a1   :  { %v2273_v53 = vadd.f32 %v2272_v26, %v2243_v61  ;;  %v3318_v26 = vld [vmem:[%s4451_s3 + $0x18] sm:$0xff] }
 0x1a2   :  { %v2062_v9 = vadd.f32 %v2047_v54, %v4359_v56  ;;  %v4394_v29 = vsel %vm2304_vm5, %v2296_v34, %v2312_v63  ;;  %v3319_v54 = vld [vmem:[%s4451_s3 + $0x20] sm:$0xff] }
 0x1a3   :  { %v3315_v63 = vld [vmem:[%s4451_s3] sm:$0xff] }
 0x1a4   :  { %v2285_v40 = vadd.f32 %v2270_v32, %v2062_v9  ;;  %v2020_v23 = vpop.f32.mrf.mxu2 }
 0x1a6   :  { %v2297_v17 = vadd.f32 %v4379_v31, %v2285_v40 }
 0x1a7   :  { %v2049_v50 = vpop.f32.mrf.mxu3  ;;  %v2245_v58 = vpop.f32.mrf.mxu0 }
 0x1a8   :  { %v2050_v14 = vadd.f32 %v2049_v50, %v2020_v23  ;;  %vm2305_vm6 = vcmp.gt.f32.partialorder %v2297_v17, 0.0  ;;  %v2313_v43 = vmul.f32 0.01, %v2297_v17  ;;  %v2274_v56 = vpop.f32.mrf.mxu1  ;;  %v2326_v23 = vld [vmem:[%s4453_s5] sm:$0x1] }
 0x1a9   :  { %v2275_v41 = vadd.f32 %v2274_v56, %v2245_v58 }
 0x1aa   :  { %v2063_v28 = vadd.f32 %v2050_v14, %v4362_v1  ;;  %v4396_v13 = vsel %vm2305_vm6, %v2297_v17, %v2313_v43  ;;  %v3316_v17 = vld [vmem:[%s4451_s3 + $0x8] sm:$0xff] }
 0x1ab   :  { %v2328_v4 = vpack.c.bf16 %v4396_v13, %v4394_v29 }
 0x1ac   :  { %v2286_v33 = vadd.f32 %v2273_v53, %v2063_v28  ;;  %v2022_v8 = vpop.f32.mrf.mxu2 }
 0x1ae   :  { %v2298_v46 = vadd.f32 %v4379_v31, %v2286_v33 }
 0x1af   :  { %v2051_v60 = vpop.f32.mrf.mxu3  ;;  %v2248_v1 = vpop.f32.mrf.mxu0 }
 0x1b0   :  { %v2052_v21 = vadd.f32 %v2051_v60, %v2022_v8  ;;  %v2277_v0 = vpop.f32.mrf.mxu1  ;;  %v2314_v10 = vmul.f32 0.01, %v2298_v46  ;;  %vm2306_vm7 = vcmp.gt.f32.partialorder %v2298_v46, 0.0 }
 0x1b1   :  { %v2278_v36 = vadd.f32 %v2277_v0, %v2248_v1 }
 0x1b2   :  { %v2064_v7 = vadd.f32 %v2052_v21, %v4364_v24  ;;  %v2322_v11 = vsel %vm2306_vm7, %v2298_v46, %v2314_v10 }
 0x1b4   :  { %v2287_v38 = vadd.f32 %v2275_v41, %v2064_v7  ;;  %v2025_v35 = vpop.f32.mrf.mxu2 }
 0x1b6   :  { %v2299_v18 = vadd.f32 %v4379_v31, %v2287_v38 }
 0x1b7   :  { %v2054_v45 = vpop.f32.mrf.mxu3  ;;  %v2250_v12 = vpop.f32.mrf.mxu0 }
 0x1b8   :  { %v2055_v48 = vadd.f32 %v2054_v45, %v2025_v35  ;;  %vm2307_vm8 = vcmp.gt.f32.partialorder %v2299_v18, 0.0  ;;  %v2315_v44 = vmul.f32 0.01, %v2299_v18  ;;  %v2279_v20 = vpop.f32.mrf.mxu1 }
 0x1b9   :  { %v2280_v5 = vadd.f32 %v2279_v20, %v2250_v12 }
 0x1ba   :  { %v2065_v19 = vadd.f32 %v2055_v48, %v4370_v42  ;;  %v2323_v24 = vsel %vm2307_vm8, %v2299_v18, %v2315_v44  ;;  %v3321_v42 = vld [vmem:[%s4451_s3 + $0x30] sm:$0xff] }
 0x1bb   :  { %v2329_v25 = vpack.c.bf16 %v2323_v24, %v2322_v11  ;;  %2423 = vmatpush.bf16.msrb.mxu3 %v3321_v42 }
 0x1bc   :  { %v2288_v62 = vadd.f32 %v2278_v36, %v2065_v19  ;;  %v2027_v6 = vpop.f32.mrf.mxu2 }
 0x1be   :  { %v2300_v37 = vadd.f32 %v4379_v31, %v2288_v62 }
 0x1bf   :  { %v2056_v2 = vpop.f32.mrf.mxu3  ;;  %2424 = vmatpush.bf16.msrb.mxu3 %v3320_v15 }
 0x1c0   :  { %v2057_v16 = vadd.f32 %v2056_v2, %v2027_v6  ;;  %v2316_v39 = vmul.f32 0.01, %v2300_v37  ;;  %vm2308_vm9 = vcmp.gt.f32.partialorder %v2300_v37, 0.0 }
 0x1c2   :  { %v2066_v51 = vadd.f32 %v2057_v16, %v1782_v49  ;;  %v2324_v34 = vsel %vm2308_vm9, %v2300_v37, %v2316_v39 }
 0x1c3   :  { %2425 = vmatpush.bf16.msrb.mxu3 %v3319_v54 }
 0x1c4   :  { %v2289_v59 = vadd.f32 %v2280_v5, %v2066_v51 }
 0x1c6   :  { %v2301_v55 = vadd.f32 %v4379_v31, %v2289_v59  ;;  %v3317_v31 = vld [vmem:[%s4451_s3 + $0x10] sm:$0xff] }
 0x1c7   :  { %2426 = vmatpush.bf16.msrb.mxu3 %v3318_v26 }
 0x1c8   :  { %vm2309_vm10 = vcmp.gt.f32.partialorder %v2301_v55, 0.0  ;;  %v2317_v61 = vmul.f32 0.01, %v2301_v55 }
 0x1ca   :  { %v2325_v32 = vsel %vm2309_vm10, %v2301_v55, %v2317_v61 }
 0x1cb   :  { %v2330_v9 = vpack.c.bf16 %v2325_v32, %v2324_v34  ;;  %2427 = vmatpush.bf16.msrb.mxu3 %v3317_v31 }
 0x1cd   :  { %v2337_v40 = vsel %vm2105_vm2, %v2330_v9, 0 }
 0x1ce   :  { %2343 = vmatpush.bf16.msrb.mxu2 %v2337_v40 }
 0x1cf   :  { %2428 = vmatpush.bf16.msrb.mxu3 %v3316_v17 }
 0x1d2   :  { %2344 = vmatpush.bf16.msrb.mxu2 %v2329_v25 }
 0x1d3   :  { %2429 = vmatpush.bf16.msrb.mxu3 %v3315_v63 }
 0x1d6   :  { %2345 = vmatpush.bf16.msrb.mxu2 %v2328_v4 }
 0x1da   :  { %2346 = vmatpush.bf16.msrb.mxu2 %v2327_v52 }
 0x1dd   :  { %3116 = vmatmul.msk.bf16.vlgmr.msrb.gmra.mxu2 %vm2331_vm11, %v2326_v23 }
 0x260   :  { %v2348_v50 = vpop.f32.mrf.mxu2 }
 0x261   :  { %v2352_v14 = vmul.f32 0.0625, %v2348_v50 }
 0x263   :  { %v2353_v43 = vpack.c.bf16 %v2352_v14, %v2352_v14 }
 0x265   :  { %2430 = vmatmul.bf16.vlgmr.msrb.gmra.mxu3 %v2353_v43 }
 0x268   :  { %v2350_v53 = vpop.f32.mrf.mxu2 }
 0x2e8   :  { %v2431_v47 = vpop.f32.mrf.mxu3 }
 0x2e9   :  { %v2432_v52 = vadd.f32 %v3341_v3, %v2431_v47 }
 0x2eb   :  { %2435 = vst [vmem:[#allocation2] sm:$0x3] %v2432_v52 }
 0x2ec   :  { %2446 = dma.vmem_to_hbm [thread:$0]  %s2442_s1, 32, %s2444_s20, [#allocation3]  }
 0x2f0   :  { %v2433_v28 = vpop.f32.mrf.mxu3 }
 0x2f1   :  { %3366 = dma.done.wait [#allocation3], 32  }
 0x2f2   :  { %3367 = vsyncadd [#allocation3], 4294967264 }
 0x2f3   :  { %2451 = vsyncpa [#allocation3], 1 }

</bundles_post_ra>
